<compile_context>
chip_gen: v6e
topology: v6e:2x2x1
jax: 0.10.0
libtpu: 0.0.40
codegen_flags: <defaults>
</compile_context>

<pallas_src>
import math

import jax
import jax.numpy as jnp
from jax import lax
from jax.experimental import pallas as pl
from jax.experimental.pallas import tpu as pltpu


def _round_up(x, m):
    return (x + m - 1) // m * m


def _make_fused_kernel(cfgs, batch, neg_slope=0.2):
    """Build the fused kernel.

    cfgs: list of per-layer static configs:
      dict(K, Cin, Cout, Lin, Lout, BLin_p, BLout_p, stride, dilation, leaky)
    kernel args: (x2d, w0, b0, w1, b1, ..., out)
      x2d : (Cin0, BLin_p0)          f32   batch folded into lanes, zero padded
      w_l : (K, Cout, Cin)           f32   scatter-form weights W_k[o,c] = w[c,o,k]
      b_l : (Cout, 1)                f32
      out : (Cout_last, BLout_p_last) f32  lane-dense (multiple of 128)
    """
    n_layers = len(cfgs)

    def kernel(*refs):
        assert len(refs) == 1 + 2 * n_layers + 1
        x_ref = refs[0]
        out_ref = refs[-1]

        a = x_ref[...].astype(jnp.float32)          # (Cin0, BLin_p0)

        for li, cfg in enumerate(cfgs):
            w_ref = refs[1 + 2 * li]                # (K, Cout, Cin)
            b_ref = refs[2 + 2 * li]                # (Cout, 1)
            K, Cout = cfg["K"], cfg["Cout"]
            Lin, Lout = cfg["Lin"], cfg["Lout"]
            s, d = cfg["stride"], cfg["dilation"]
            BLin_p, BLout_p = cfg["BLin_p"], cfg["BLout_p"]

            # --- build the tap-0 scatter target column for every (row, col) ---
            # row j = b*Lin + l maps (for tap k) to column b*Lout + l*s + k*d.
            row = lax.broadcasted_iota(jnp.int32, (BLin_p, BLout_p), 0)
            col = lax.broadcasted_iota(jnp.int32, (BLin_p, BLout_p), 1)
            sentinel = jnp.full((BLin_p, BLout_p), -(1 << 20), jnp.int32)
            target = sentinel
            for b in range(batch):                  # batch is tiny & static
                in_b = (row >= b * Lin) & (row < (b + 1) * Lin)
                target = jnp.where(in_b, (row - b * Lin) * s + b * Lout, target)
            # padded rows keep the far-negative sentinel -> never match any col.

            acc = jnp.zeros((Cout, BLout_p), jnp.float32)
            for k in range(K):                      # K is tiny & static
                t_k = (col == target + k * d).astype(jnp.float32)   # (BLin_p, BLout_p)
                p = jnp.dot(w_ref[k], a, preferred_element_type=jnp.float32)  # (Cout, BLin_p)
                acc = acc + jnp.dot(p, t_k, preferred_element_type=jnp.float32)
            acc = acc + b_ref[...]
            if cfg["leaky"]:
                acc = jnp.where(acc >= 0.0, acc, neg_slope * acc)
            a = acc                                  # (Cout, BLout_p) feeds next layer

        out_ref[...] = a.astype(out_ref.dtype)

    return kernel


def _ref_conv_transpose1d(x, w, b, stride, dilation, output_padding, leaky):
    """Pure-JAX reference (scatter form of ConvTranspose1d) for correctness checking."""
    B, Cin, L = x.shape
    _, Cout, K = w.shape
    Lout = (L - 1) * stride + dilation * (K - 1) + output_padding + 1
    y = jnp.zeros((B, Cout, Lout), jnp.float32)
    for k in range(K):
        contrib = jnp.einsum("bci,co->boi", x, w[:, :, k])
        y = y.at[:, :, k * dilation : k * dilation + (L - 1) * stride + 1 : stride].add(contrib)
    y = y + b[None, :, None]
    if leaky:
        y = jnp.where(y >= 0.0, y, 0.2 * y)
    return y


class DeConvNet1dPallas:
    """Pallas port of DeConvNet1d (batch_norm=False, dropout=None)."""
    # TODO(synk): BatchNorm1d / Dropout branches are disabled by the default config and not implemented.

    def __init__(self, key, in_channels, hidden_channels, out_channels, out_kernel,
                 kernel_lengths, stride=1, dilation=1, output_padding=1):
        assert len(hidden_channels) == len(kernel_lengths)
        self.stride = stride
        self.dilation = dilation
        self.layers = []  # list of (w (Cin,Cout,K), b (Cout,), output_padding, leaky)
        cin = in_channels
        ks = list(kernel_lengths) + [out_kernel]
        couts = list(hidden_channels) + [out_channels]
        for i, (cout, K) in enumerate(zip(couts, ks)):
            key, kw, kb = jax.random.split(key, 3)
            bound = 1.0 / math.sqrt(cin * K)
            w = jax.random.uniform(kw, (cin, cout, K), jnp.float32, -bound, bound)
            b = jax.random.uniform(kb, (cout,), jnp.float32, -bound, bound)
            is_last = i == len(ks) - 1
            # hidden layers use output_padding + LeakyReLU; the final layer uses neither
            self.layers.append((w, b, 0 if is_last else output_padding, not is_last))
            cin = cout

    def __call__(self, x):
        B, C0, L0 = x.shape

        # --- per-layer static geometry (also defines lane padding) ---
        cfgs = []
        Lin = L0
        for (w, b, op, leaky) in self.layers:
            Cin, Cout, K = w.shape
            Lout = (Lin - 1) * self.stride + self.dilation * (K - 1) + op + 1
            cfgs.append(dict(K=K, Cin=Cin, Cout=Cout, Lin=Lin, Lout=Lout,
                             BLin_p=_round_up(B * Lin, 128),
                             BLout_p=_round_up(B * Lout, 128),
                             stride=self.stride, dilation=self.dilation,
                             leaky=leaky))
            Lin = Lout
        Cout_f, Lout_f = cfgs[-1]["Cout"], cfgs[-1]["Lout"]

        # --- layout plumbing (tiny): fold batch into lanes, zero pad to x128 ---
        x2d = jnp.transpose(x, (1, 0, 2)).reshape(C0, B * L0)
        x2d = jnp.pad(x2d, ((0, 0), (0, cfgs[0]["BLin_p"] - B * L0)))

        flat_params = []
        for (w, b, op, leaky), cfg in zip(self.layers, cfgs):
            wk = jnp.transpose(w, (2, 1, 0))         # scatter form: (K, Cout, Cin), no flip
            flat_params += [wk, b.reshape(cfg["Cout"], 1)]

        kernel = _make_fused_kernel(cfgs, B)
        y2d = pl.pallas_call(
            kernel,
            out_shape=jax.ShapeDtypeStruct((Cout_f, cfgs[-1]["BLout_p"]), jnp.float32),
            compiler_params=pltpu.CompilerParams(vmem_limit_bytes=32 * 1024 * 1024),
        )(x2d, *flat_params)

        # unpack lane-dense (Cout, B*Lout_pad) -> (B, Cout, Lout)
        y = y2d[:, : B * Lout_f].reshape(Cout_f, B, Lout_f)
        return jnp.transpose(y, (1, 0, 2))

    def reference(self, x):
        for w, b, op, leaky in self.layers:
            x = _ref_conv_transpose1d(x, w, b, self.stride, self.dilation, op, leaky)
        return x


if __name__ == "__main__":
    key = jax.random.PRNGKey(0)
    k_params, k_x = jax.random.split(key)

    # small config consistent with the module's constructor
    model = DeConvNet1dPallas(
        k_params,
        in_channels=4,
        hidden_channels=[8, 8],
        out_channels=3,
        out_kernel=3,
        kernel_lengths=[5, 3],
        stride=2,            # stride > output_padding, as PyTorch requires
        dilation=1,
        output_padding=1,
    )

    x = jax.random.normal(k_x, (2, 4, 16), jnp.float32)   # (batch, channels, length)

    y = jax.block_until_ready(model(x))

    y_ref = model.reference(x)
    assert y.shape == y_ref.shape, (y.shape, y_ref.shape)
    assert jnp.allclose(y, y_ref, atol=1e-4, rtol=1e-4), float(jnp.max(jnp.abs(y - y_ref)))

    print("KERNEL_OK")
</pallas_src>

<mosaic_0001>
module attributes {stable_mosaic.version = 11 : i64} {
  func.func @kernel(%arg0: memref<4x128xf32, #tpu.memory_space<vmem>>, %arg1: memref<5x8x4xf32, #tpu.memory_space<vmem>>, %arg2: memref<8x1xf32, #tpu.memory_space<vmem>>, %arg3: memref<3x8x8xf32, #tpu.memory_space<vmem>>, %arg4: memref<8x1xf32, #tpu.memory_space<vmem>>, %arg5: memref<3x3x8xf32, #tpu.memory_space<vmem>>, %arg6: memref<3x1xf32, #tpu.memory_space<vmem>>, %arg7: memref<3x384xf32, #tpu.memory_space<vmem>>) attributes {dimension_semantics = [], scalar_prefetch = 0 : i64, scratch_operands = 0 : i64, tpu.core_type = #tpu.core_type<tc>} {
    %c0 = arith.constant 0 : index
    %c0_0 = arith.constant 0 : index
    %0 = vector.load %arg0[%c0, %c0_0] : memref<4x128xf32, #tpu.memory_space<vmem>>, vector<4x128xf32>
    %1 = tpu.iota {dimensions = array<i32: 0>} : vector<128x128xi32>
    %2 = tpu.iota {dimensions = array<i32: 1>} : vector<128x128xi32>
    %c-1048576_i32 = arith.constant -1048576 : i32
    %3 = vector.broadcast %c-1048576_i32 : i32 to vector<128x128xi32>
    %c0_i32 = arith.constant 0 : i32
    %4 = vector.broadcast %c0_i32 : i32 to vector<128x128xi32>
    %5 = arith.cmpi sge, %1, %4 : vector<128x128xi32>
    %c16_i32 = arith.constant 16 : i32
    %6 = vector.broadcast %c16_i32 : i32 to vector<128x128xi32>
    %7 = arith.cmpi slt, %1, %6 : vector<128x128xi32>
    %8 = arith.andi %5, %7 : vector<128x128xi1>
    %c0_i32_1 = arith.constant 0 : i32
    %9 = vector.broadcast %c0_i32_1 : i32 to vector<128x128xi32>
    %10 = arith.subi %1, %9 : vector<128x128xi32>
    %c2_i32 = arith.constant 2 : i32
    %11 = vector.broadcast %c2_i32 : i32 to vector<128x128xi32>
    %12 = arith.muli %10, %11 : vector<128x128xi32>
    %c0_i32_2 = arith.constant 0 : i32
    %13 = vector.broadcast %c0_i32_2 : i32 to vector<128x128xi32>
    %14 = arith.addi %12, %13 : vector<128x128xi32>
    %15 = arith.select %8, %14, %3 : vector<128x128xi1>, vector<128x128xi32>
    %c16_i32_3 = arith.constant 16 : i32
    %16 = vector.broadcast %c16_i32_3 : i32 to vector<128x128xi32>
    %17 = arith.cmpi sge, %1, %16 : vector<128x128xi32>
    %c32_i32 = arith.constant 32 : i32
    %18 = vector.broadcast %c32_i32 : i32 to vector<128x128xi32>
    %19 = arith.cmpi slt, %1, %18 : vector<128x128xi32>
    %20 = arith.andi %17, %19 : vector<128x128xi1>
    %c16_i32_4 = arith.constant 16 : i32
    %21 = vector.broadcast %c16_i32_4 : i32 to vector<128x128xi32>
    %22 = arith.subi %1, %21 : vector<128x128xi32>
    %c2_i32_5 = arith.constant 2 : i32
    %23 = vector.broadcast %c2_i32_5 : i32 to vector<128x128xi32>
    %24 = arith.muli %22, %23 : vector<128x128xi32>
    %c36_i32 = arith.constant 36 : i32
    %25 = vector.broadcast %c36_i32 : i32 to vector<128x128xi32>
    %26 = arith.addi %24, %25 : vector<128x128xi32>
    %27 = arith.select %20, %26, %15 : vector<128x128xi1>, vector<128x128xi32>
    %cst = arith.constant 0.000000e+00 : f32
    %28 = vector.broadcast %cst : f32 to vector<8x128xf32>
    %c0_i32_6 = arith.constant 0 : i32
    %29 = vector.broadcast %c0_i32_6 : i32 to vector<128x128xi32>
    %30 = arith.addi %27, %29 : vector<128x128xi32>
    %31 = arith.cmpi eq, %2, %30 : vector<128x128xi32>
    %32 = arith.extui %31 : vector<128x128xi1> to vector<128x128xi32>
    %33 = arith.sitofp %32 : vector<128x128xi32> to vector<128x128xf32>
    %c0_7 = arith.constant 0 : index
    %c0_8 = arith.constant 0 : index
    %c0_9 = arith.constant 0 : index
    %34 = vector.load %arg1[%c0_7, %c0_8, %c0_9] : memref<5x8x4xf32, #tpu.memory_space<vmem>>, vector<1x8x4xf32>
    %35 = vector.shape_cast %34 : vector<1x8x4xf32> to vector<8x4xf32>
    %cst_10 = arith.constant dense<0.000000e+00> : vector<8x128xf32>
    %36 = tpu.matmul %35, %0, %cst_10 {dimension_numbers = #tpu.dot_dimension_numbers<[1], [0], [0], [1], [0, 0, 1, 1], [], []>} : vector<8x4xf32>, vector<4x128xf32>, vector<8x128xf32> -> vector<8x128xf32>
    %cst_11 = arith.constant dense<0.000000e+00> : vector<8x128xf32>
    %37 = tpu.matmul %36, %33, %cst_11 {dimension_numbers = #tpu.dot_dimension_numbers<[1], [0], [0], [1], [0, 0, 1, 1], [], []>} : vector<8x128xf32>, vector<128x128xf32>, vector<8x128xf32> -> vector<8x128xf32>
    %38 = arith.addf %28, %37 : vector<8x128xf32>
    %c1_i32 = arith.constant 1 : i32
    %39 = vector.broadcast %c1_i32 : i32 to vector<128x128xi32>
    %40 = arith.addi %27, %39 : vector<128x128xi32>
    %41 = arith.cmpi eq, %2, %40 : vector<128x128xi32>
    %42 = arith.extui %41 : vector<128x128xi1> to vector<128x128xi32>
    %43 = arith.sitofp %42 : vector<128x128xi32> to vector<128x128xf32>
    %c1 = arith.constant 1 : index
    %c0_12 = arith.constant 0 : index
    %c0_13 = arith.constant 0 : index
    %44 = vector.load %arg1[%c1, %c0_12, %c0_13] : memref<5x8x4xf32, #tpu.memory_space<vmem>>, vector<1x8x4xf32>
    %45 = vector.shape_cast %44 : vector<1x8x4xf32> to vector<8x4xf32>
    %cst_14 = arith.constant dense<0.000000e+00> : vector<8x128xf32>
    %46 = tpu.matmul %45, %0, %cst_14 {dimension_numbers = #tpu.dot_dimension_numbers<[1], [0], [0], [1], [0, 0, 1, 1], [], []>} : vector<8x4xf32>, vector<4x128xf32>, vector<8x128xf32> -> vector<8x128xf32>
    %cst_15 = arith.constant dense<0.000000e+00> : vector<8x128xf32>
    %47 = tpu.matmul %46, %43, %cst_15 {dimension_numbers = #tpu.dot_dimension_numbers<[1], [0], [0], [1], [0, 0, 1, 1], [], []>} : vector<8x128xf32>, vector<128x128xf32>, vector<8x128xf32> -> vector<8x128xf32>
    %48 = arith.addf %38, %47 : vector<8x128xf32>
    %c2_i32_16 = arith.constant 2 : i32
    %49 = vector.broadcast %c2_i32_16 : i32 to vector<128x128xi32>
    %50 = arith.addi %27, %49 : vector<128x128xi32>
    %51 = arith.cmpi eq, %2, %50 : vector<128x128xi32>
    %52 = arith.extui %51 : vector<128x128xi1> to vector<128x128xi32>
    %53 = arith.sitofp %52 : vector<128x128xi32> to vector<128x128xf32>
    %c2 = arith.constant 2 : index
    %c0_17 = arith.constant 0 : index
    %c0_18 = arith.constant 0 : index
    %54 = vector.load %arg1[%c2, %c0_17, %c0_18] : memref<5x8x4xf32, #tpu.memory_space<vmem>>, vector<1x8x4xf32>
    %55 = vector.shape_cast %54 : vector<1x8x4xf32> to vector<8x4xf32>
    %cst_19 = arith.constant dense<0.000000e+00> : vector<8x128xf32>
    %56 = tpu.matmul %55, %0, %cst_19 {dimension_numbers = #tpu.dot_dimension_numbers<[1], [0], [0], [1], [0, 0, 1, 1], [], []>} : vector<8x4xf32>, vector<4x128xf32>, vector<8x128xf32> -> vector<8x128xf32>
    %cst_20 = arith.constant dense<0.000000e+00> : vector<8x128xf32>
    %57 = tpu.matmul %56, %53, %cst_20 {dimension_numbers = #tpu.dot_dimension_numbers<[1], [0], [0], [1], [0, 0, 1, 1], [], []>} : vector<8x128xf32>, vector<128x128xf32>, vector<8x128xf32> -> vector<8x128xf32>
    %58 = arith.addf %48, %57 : vector<8x128xf32>
    %c3_i32 = arith.constant 3 : i32
    %59 = vector.broadcast %c3_i32 : i32 to vector<128x128xi32>
    %60 = arith.addi %27, %59 : vector<128x128xi32>
    %61 = arith.cmpi eq, %2, %60 : vector<128x128xi32>
    %62 = arith.extui %61 : vector<128x128xi1> to vector<128x128xi32>
    %63 = arith.sitofp %62 : vector<128x128xi32> to vector<128x128xf32>
    %c3 = arith.constant 3 : index
    %c0_21 = arith.constant 0 : index
    %c0_22 = arith.constant 0 : index
    %64 = vector.load %arg1[%c3, %c0_21, %c0_22] : memref<5x8x4xf32, #tpu.memory_space<vmem>>, vector<1x8x4xf32>
    %65 = vector.shape_cast %64 : vector<1x8x4xf32> to vector<8x4xf32>
    %cst_23 = arith.constant dense<0.000000e+00> : vector<8x128xf32>
    %66 = tpu.matmul %65, %0, %cst_23 {dimension_numbers = #tpu.dot_dimension_numbers<[1], [0], [0], [1], [0, 0, 1, 1], [], []>} : vector<8x4xf32>, vector<4x128xf32>, vector<8x128xf32> -> vector<8x128xf32>
    %cst_24 = arith.constant dense<0.000000e+00> : vector<8x128xf32>
    %67 = tpu.matmul %66, %63, %cst_24 {dimension_numbers = #tpu.dot_dimension_numbers<[1], [0], [0], [1], [0, 0, 1, 1], [], []>} : vector<8x128xf32>, vector<128x128xf32>, vector<8x128xf32> -> vector<8x128xf32>
    %68 = arith.addf %58, %67 : vector<8x128xf32>
    %c4_i32 = arith.constant 4 : i32
    %69 = vector.broadcast %c4_i32 : i32 to vector<128x128xi32>
    %70 = arith.addi %27, %69 : vector<128x128xi32>
    %71 = arith.cmpi eq, %2, %70 : vector<128x128xi32>
    %72 = arith.extui %71 : vector<128x128xi1> to vector<128x128xi32>
    %73 = arith.sitofp %72 : vector<128x128xi32> to vector<128x128xf32>
    %c4 = arith.constant 4 : index
    %c0_25 = arith.constant 0 : index
    %c0_26 = arith.constant 0 : index
    %74 = vector.load %arg1[%c4, %c0_25, %c0_26] : memref<5x8x4xf32, #tpu.memory_space<vmem>>, vector<1x8x4xf32>
    %75 = vector.shape_cast %74 : vector<1x8x4xf32> to vector<8x4xf32>
    %cst_27 = arith.constant dense<0.000000e+00> : vector<8x128xf32>
    %76 = tpu.matmul %75, %0, %cst_27 {dimension_numbers = #tpu.dot_dimension_numbers<[1], [0], [0], [1], [0, 0, 1, 1], [], []>} : vector<8x4xf32>, vector<4x128xf32>, vector<8x128xf32> -> vector<8x128xf32>
    %cst_28 = arith.constant dense<0.000000e+00> : vector<8x128xf32>
    %77 = tpu.matmul %76, %73, %cst_28 {dimension_numbers = #tpu.dot_dimension_numbers<[1], [0], [0], [1], [0, 0, 1, 1], [], []>} : vector<8x128xf32>, vector<128x128xf32>, vector<8x128xf32> -> vector<8x128xf32>
    %78 = arith.addf %68, %77 : vector<8x128xf32>
    %c0_29 = arith.constant 0 : index
    %c0_30 = arith.constant 0 : index
    %79 = vector.load %arg2[%c0_29, %c0_30] : memref<8x1xf32, #tpu.memory_space<vmem>>, vector<8x1xf32>
    %80 = vector.broadcast %79 : vector<8x1xf32> to vector<8x128xf32>
    %81 = arith.addf %78, %80 : vector<8x128xf32>
    %cst_31 = arith.constant 0.000000e+00 : f32
    %82 = vector.broadcast %cst_31 : f32 to vector<8x128xf32>
    %83 = arith.cmpf oge, %81, %82 : vector<8x128xf32>
    %cst_32 = arith.constant 2.000000e-01 : f32
    %84 = vector.broadcast %cst_32 : f32 to vector<8x128xf32>
    %85 = arith.mulf %84, %81 : vector<8x128xf32>
    %86 = arith.select %83, %81, %85 : vector<8x128xi1>, vector<8x128xf32>
    %87 = tpu.iota {dimensions = array<i32: 0>} : vector<128x256xi32>
    %88 = tpu.iota {dimensions = array<i32: 1>} : vector<128x256xi32>
    %c-1048576_i32_33 = arith.constant -1048576 : i32
    %89 = vector.broadcast %c-1048576_i32_33 : i32 to vector<128x256xi32>
    %c0_i32_34 = arith.constant 0 : i32
    %90 = vector.broadcast %c0_i32_34 : i32 to vector<128x256xi32>
    %91 = arith.cmpi sge, %87, %90 : vector<128x256xi32>
    %c36_i32_35 = arith.constant 36 : i32
    %92 = vector.broadcast %c36_i32_35 : i32 to vector<128x256xi32>
    %93 = arith.cmpi slt, %87, %92 : vector<128x256xi32>
    %94 = arith.andi %91, %93 : vector<128x256xi1>
    %c0_i32_36 = arith.constant 0 : i32
    %95 = vector.broadcast %c0_i32_36 : i32 to vector<128x256xi32>
    %96 = arith.subi %87, %95 : vector<128x256xi32>
    %c2_i32_37 = arith.constant 2 : i32
    %97 = vector.broadcast %c2_i32_37 : i32 to vector<128x256xi32>
    %98 = arith.muli %96, %97 : vector<128x256xi32>
    %c0_i32_38 = arith.constant 0 : i32
    %99 = vector.broadcast %c0_i32_38 : i32 to vector<128x256xi32>
    %100 = arith.addi %98, %99 : vector<128x256xi32>
    %101 = arith.select %94, %100, %89 : vector<128x256xi1>, vector<128x256xi32>
    %c36_i32_39 = arith.constant 36 : i32
    %102 = vector.broadcast %c36_i32_39 : i32 to vector<128x256xi32>
    %103 = arith.cmpi sge, %87, %102 : vector<128x256xi32>
    %c72_i32 = arith.constant 72 : i32
    %104 = vector.broadcast %c72_i32 : i32 to vector<128x256xi32>
    %105 = arith.cmpi slt, %87, %104 : vector<128x256xi32>
    %106 = arith.andi %103, %105 : vector<128x256xi1>
    %c36_i32_40 = arith.constant 36 : i32
    %107 = vector.broadcast %c36_i32_40 : i32 to vector<128x256xi32>
    %108 = arith.subi %87, %107 : vector<128x256xi32>
    %c2_i32_41 = arith.constant 2 : i32
    %109 = vector.broadcast %c2_i32_41 : i32 to vector<128x256xi32>
    %110 = arith.muli %108, %109 : vector<128x256xi32>
    %c74_i32 = arith.constant 74 : i32
    %111 = vector.broadcast %c74_i32 : i32 to vector<128x256xi32>
    %112 = arith.addi %110, %111 : vector<128x256xi32>
    %113 = arith.select %106, %112, %101 : vector<128x256xi1>, vector<128x256xi32>
    %cst_42 = arith.constant 0.000000e+00 : f32
    %114 = vector.broadcast %cst_42 : f32 to vector<8x256xf32>
    %c0_i32_43 = arith.constant 0 : i32
    %115 = vector.broadcast %c0_i32_43 : i32 to vector<128x256xi32>
    %116 = arith.addi %113, %115 : vector<128x256xi32>
    %117 = arith.cmpi eq, %88, %116 : vector<128x256xi32>
    %118 = arith.extui %117 : vector<128x256xi1> to vector<128x256xi32>
    %119 = arith.sitofp %118 : vector<128x256xi32> to vector<128x256xf32>
    %c0_44 = arith.constant 0 : index
    %c0_45 = arith.constant 0 : index
    %c0_46 = arith.constant 0 : index
    %120 = vector.load %arg3[%c0_44, %c0_45, %c0_46] : memref<3x8x8xf32, #tpu.memory_space<vmem>>, vector<1x8x8xf32>
    %121 = vector.shape_cast %120 : vector<1x8x8xf32> to vector<8x8xf32>
    %cst_47 = arith.constant dense<0.000000e+00> : vector<8x128xf32>
    %122 = tpu.matmul %121, %86, %cst_47 {dimension_numbers = #tpu.dot_dimension_numbers<[1], [0], [0], [1], [0, 0, 1, 1], [], []>} : vector<8x8xf32>, vector<8x128xf32>, vector<8x128xf32> -> vector<8x128xf32>
    %cst_48 = arith.constant dense<0.000000e+00> : vector<8x256xf32>
    %123 = tpu.matmul %122, %119, %cst_48 {dimension_numbers = #tpu.dot_dimension_numbers<[1], [0], [0], [1], [0, 0, 1, 1], [], []>} : vector<8x128xf32>, vector<128x256xf32>, vector<8x256xf32> -> vector<8x256xf32>
    %124 = arith.addf %114, %123 : vector<8x256xf32>
    %c1_i32_49 = arith.constant 1 : i32
    %125 = vector.broadcast %c1_i32_49 : i32 to vector<128x256xi32>
    %126 = arith.addi %113, %125 : vector<128x256xi32>
    %127 = arith.cmpi eq, %88, %126 : vector<128x256xi32>
    %128 = arith.extui %127 : vector<128x256xi1> to vector<128x256xi32>
    %129 = arith.sitofp %128 : vector<128x256xi32> to vector<128x256xf32>
    %c1_50 = arith.constant 1 : index
    %c0_51 = arith.constant 0 : index
    %c0_52 = arith.constant 0 : index
    %130 = vector.load %arg3[%c1_50, %c0_51, %c0_52] : memref<3x8x8xf32, #tpu.memory_space<vmem>>, vector<1x8x8xf32>
    %131 = vector.shape_cast %130 : vector<1x8x8xf32> to vector<8x8xf32>
    %cst_53 = arith.constant dense<0.000000e+00> : vector<8x128xf32>
    %132 = tpu.matmul %131, %86, %cst_53 {dimension_numbers = #tpu.dot_dimension_numbers<[1], [0], [0], [1], [0, 0, 1, 1], [], []>} : vector<8x8xf32>, vector<8x128xf32>, vector<8x128xf32> -> vector<8x128xf32>
    %cst_54 = arith.constant dense<0.000000e+00> : vector<8x256xf32>
    %133 = tpu.matmul %132, %129, %cst_54 {dimension_numbers = #tpu.dot_dimension_numbers<[1], [0], [0], [1], [0, 0, 1, 1], [], []>} : vector<8x128xf32>, vector<128x256xf32>, vector<8x256xf32> -> vector<8x256xf32>
    %134 = arith.addf %124, %133 : vector<8x256xf32>
    %c2_i32_55 = arith.constant 2 : i32
    %135 = vector.broadcast %c2_i32_55 : i32 to vector<128x256xi32>
    %136 = arith.addi %113, %135 : vector<128x256xi32>
    %137 = arith.cmpi eq, %88, %136 : vector<128x256xi32>
    %138 = arith.extui %137 : vector<128x256xi1> to vector<128x256xi32>
    %139 = arith.sitofp %138 : vector<128x256xi32> to vector<128x256xf32>
    %c2_56 = arith.constant 2 : index
    %c0_57 = arith.constant 0 : index
    %c0_58 = arith.constant 0 : index
    %140 = vector.load %arg3[%c2_56, %c0_57, %c0_58] : memref<3x8x8xf32, #tpu.memory_space<vmem>>, vector<1x8x8xf32>
    %141 = vector.shape_cast %140 : vector<1x8x8xf32> to vector<8x8xf32>
    %cst_59 = arith.constant dense<0.000000e+00> : vector<8x128xf32>
    %142 = tpu.matmul %141, %86, %cst_59 {dimension_numbers = #tpu.dot_dimension_numbers<[1], [0], [0], [1], [0, 0, 1, 1], [], []>} : vector<8x8xf32>, vector<8x128xf32>, vector<8x128xf32> -> vector<8x128xf32>
    %cst_60 = arith.constant dense<0.000000e+00> : vector<8x256xf32>
    %143 = tpu.matmul %142, %139, %cst_60 {dimension_numbers = #tpu.dot_dimension_numbers<[1], [0], [0], [1], [0, 0, 1, 1], [], []>} : vector<8x128xf32>, vector<128x256xf32>, vector<8x256xf32> -> vector<8x256xf32>
    %144 = arith.addf %134, %143 : vector<8x256xf32>
    %c0_61 = arith.constant 0 : index
    %c0_62 = arith.constant 0 : index
    %145 = vector.load %arg4[%c0_61, %c0_62] : memref<8x1xf32, #tpu.memory_space<vmem>>, vector<8x1xf32>
    %146 = vector.broadcast %145 : vector<8x1xf32> to vector<8x256xf32>
    %147 = arith.addf %144, %146 : vector<8x256xf32>
    %cst_63 = arith.constant 0.000000e+00 : f32
    %148 = vector.broadcast %cst_63 : f32 to vector<8x256xf32>
    %149 = arith.cmpf oge, %147, %148 : vector<8x256xf32>
    %cst_64 = arith.constant 2.000000e-01 : f32
    %150 = vector.broadcast %cst_64 : f32 to vector<8x256xf32>
    %151 = arith.mulf %150, %147 : vector<8x256xf32>
    %152 = arith.select %149, %147, %151 : vector<8x256xi1>, vector<8x256xf32>
    %153 = tpu.iota {dimensions = array<i32: 0>} : vector<256x384xi32>
    %154 = tpu.iota {dimensions = array<i32: 1>} : vector<256x384xi32>
    %c-1048576_i32_65 = arith.constant -1048576 : i32
    %155 = vector.broadcast %c-1048576_i32_65 : i32 to vector<256x384xi32>
    %c0_i32_66 = arith.constant 0 : i32
    %156 = vector.broadcast %c0_i32_66 : i32 to vector<256x384xi32>
    %157 = arith.cmpi sge, %153, %156 : vector<256x384xi32>
    %c74_i32_67 = arith.constant 74 : i32
    %158 = vector.broadcast %c74_i32_67 : i32 to vector<256x384xi32>
    %159 = arith.cmpi slt, %153, %158 : vector<256x384xi32>
    %160 = arith.andi %157, %159 : vector<256x384xi1>
    %c0_i32_68 = arith.constant 0 : i32
    %161 = vector.broadcast %c0_i32_68 : i32 to vector<256x384xi32>
    %162 = arith.subi %153, %161 : vector<256x384xi32>
    %c2_i32_69 = arith.constant 2 : i32
    %163 = vector.broadcast %c2_i32_69 : i32 to vector<256x384xi32>
    %164 = arith.muli %162, %163 : vector<256x384xi32>
    %c0_i32_70 = arith.constant 0 : i32
    %165 = vector.broadcast %c0_i32_70 : i32 to vector<256x384xi32>
    %166 = arith.addi %164, %165 : vector<256x384xi32>
    %167 = arith.select %160, %166, %155 : vector<256x384xi1>, vector<256x384xi32>
    %c74_i32_71 = arith.constant 74 : i32
    %168 = vector.broadcast %c74_i32_71 : i32 to vector<256x384xi32>
    %169 = arith.cmpi sge, %153, %168 : vector<256x384xi32>
    %c148_i32 = arith.constant 148 : i32
    %170 = vector.broadcast %c148_i32 : i32 to vector<256x384xi32>
    %171 = arith.cmpi slt, %153, %170 : vector<256x384xi32>
    %172 = arith.andi %169, %171 : vector<256x384xi1>
    %c74_i32_72 = arith.constant 74 : i32
    %173 = vector.broadcast %c74_i32_72 : i32 to vector<256x384xi32>
    %174 = arith.subi %153, %173 : vector<256x384xi32>
    %c2_i32_73 = arith.constant 2 : i32
    %175 = vector.broadcast %c2_i32_73 : i32 to vector<256x384xi32>
    %176 = arith.muli %174, %175 : vector<256x384xi32>
    %c149_i32 = arith.constant 149 : i32
    %177 = vector.broadcast %c149_i32 : i32 to vector<256x384xi32>
    %178 = arith.addi %176, %177 : vector<256x384xi32>
    %179 = arith.select %172, %178, %167 : vector<256x384xi1>, vector<256x384xi32>
    %cst_74 = arith.constant 0.000000e+00 : f32
    %180 = vector.broadcast %cst_74 : f32 to vector<3x384xf32>
    %c0_i32_75 = arith.constant 0 : i32
    %181 = vector.broadcast %c0_i32_75 : i32 to vector<256x384xi32>
    %182 = arith.addi %179, %181 : vector<256x384xi32>
    %183 = arith.cmpi eq, %154, %182 : vector<256x384xi32>
    %184 = arith.extui %183 : vector<256x384xi1> to vector<256x384xi32>
    %185 = arith.sitofp %184 : vector<256x384xi32> to vector<256x384xf32>
    %c0_76 = arith.constant 0 : index
    %c0_77 = arith.constant 0 : index
    %c0_78 = arith.constant 0 : index
    %186 = vector.load %arg5[%c0_76, %c0_77, %c0_78] : memref<3x3x8xf32, #tpu.memory_space<vmem>>, vector<1x3x8xf32>
    %187 = vector.shape_cast %186 : vector<1x3x8xf32> to vector<3x8xf32>
    %cst_79 = arith.constant dense<0.000000e+00> : vector<3x256xf32>
    %188 = tpu.matmul %187, %152, %cst_79 {dimension_numbers = #tpu.dot_dimension_numbers<[1], [0], [0], [1], [0, 0, 1, 1], [], []>} : vector<3x8xf32>, vector<8x256xf32>, vector<3x256xf32> -> vector<3x256xf32>
    %cst_80 = arith.constant dense<0.000000e+00> : vector<3x384xf32>
    %189 = tpu.matmul %188, %185, %cst_80 {dimension_numbers = #tpu.dot_dimension_numbers<[1], [0], [0], [1], [0, 0, 1, 1], [], []>} : vector<3x256xf32>, vector<256x384xf32>, vector<3x384xf32> -> vector<3x384xf32>
    %190 = arith.addf %180, %189 : vector<3x384xf32>
    %c1_i32_81 = arith.constant 1 : i32
    %191 = vector.broadcast %c1_i32_81 : i32 to vector<256x384xi32>
    %192 = arith.addi %179, %191 : vector<256x384xi32>
    %193 = arith.cmpi eq, %154, %192 : vector<256x384xi32>
    %194 = arith.extui %193 : vector<256x384xi1> to vector<256x384xi32>
    %195 = arith.sitofp %194 : vector<256x384xi32> to vector<256x384xf32>
    %c1_82 = arith.constant 1 : index
    %c0_83 = arith.constant 0 : index
    %c0_84 = arith.constant 0 : index
    %196 = vector.load %arg5[%c1_82, %c0_83, %c0_84] : memref<3x3x8xf32, #tpu.memory_space<vmem>>, vector<1x3x8xf32>
    %197 = vector.shape_cast %196 : vector<1x3x8xf32> to vector<3x8xf32>
    %cst_85 = arith.constant dense<0.000000e+00> : vector<3x256xf32>
    %198 = tpu.matmul %197, %152, %cst_85 {dimension_numbers = #tpu.dot_dimension_numbers<[1], [0], [0], [1], [0, 0, 1, 1], [], []>} : vector<3x8xf32>, vector<8x256xf32>, vector<3x256xf32> -> vector<3x256xf32>
    %cst_86 = arith.constant dense<0.000000e+00> : vector<3x384xf32>
    %199 = tpu.matmul %198, %195, %cst_86 {dimension_numbers = #tpu.dot_dimension_numbers<[1], [0], [0], [1], [0, 0, 1, 1], [], []>} : vector<3x256xf32>, vector<256x384xf32>, vector<3x384xf32> -> vector<3x384xf32>
    %200 = arith.addf %190, %199 : vector<3x384xf32>
    %c2_i32_87 = arith.constant 2 : i32
    %201 = vector.broadcast %c2_i32_87 : i32 to vector<256x384xi32>
    %202 = arith.addi %179, %201 : vector<256x384xi32>
    %203 = arith.cmpi eq, %154, %202 : vector<256x384xi32>
    %204 = arith.extui %203 : vector<256x384xi1> to vector<256x384xi32>
    %205 = arith.sitofp %204 : vector<256x384xi32> to vector<256x384xf32>
    %c2_88 = arith.constant 2 : index
    %c0_89 = arith.constant 0 : index
    %c0_90 = arith.constant 0 : index
    %206 = vector.load %arg5[%c2_88, %c0_89, %c0_90] : memref<3x3x8xf32, #tpu.memory_space<vmem>>, vector<1x3x8xf32>
    %207 = vector.shape_cast %206 : vector<1x3x8xf32> to vector<3x8xf32>
    %cst_91 = arith.constant dense<0.000000e+00> : vector<3x256xf32>
    %208 = tpu.matmul %207, %152, %cst_91 {dimension_numbers = #tpu.dot_dimension_numbers<[1], [0], [0], [1], [0, 0, 1, 1], [], []>} : vector<3x8xf32>, vector<8x256xf32>, vector<3x256xf32> -> vector<3x256xf32>
    %cst_92 = arith.constant dense<0.000000e+00> : vector<3x384xf32>
    %209 = tpu.matmul %208, %205, %cst_92 {dimension_numbers = #tpu.dot_dimension_numbers<[1], [0], [0], [1], [0, 0, 1, 1], [], []>} : vector<3x256xf32>, vector<256x384xf32>, vector<3x384xf32> -> vector<3x384xf32>
    %210 = arith.addf %200, %209 : vector<3x384xf32>
    %c0_93 = arith.constant 0 : index
    %c0_94 = arith.constant 0 : index
    %211 = vector.load %arg6[%c0_93, %c0_94] : memref<3x1xf32, #tpu.memory_space<vmem>>, vector<3x1xf32>
    %212 = vector.broadcast %211 : vector<3x1xf32> to vector<3x384xf32>
    %213 = arith.addf %210, %212 : vector<3x384xf32>
    %c0_95 = arith.constant 0 : index
    %c0_96 = arith.constant 0 : index
    %214 = vector.load %arg7[%c0_95, %c0_96] : memref<3x384xf32, #tpu.memory_space<vmem>>, vector<3x384xf32>
    tpu.vector_store %arg7[%c0_95, %c0_96], %213 {strides = array<i32>} : memref<3x384xf32, #tpu.memory_space<vmem>>, vector<3x384xf32>,
    return
  }
}

</mosaic_0001>

<bundles_post_ra>
// kernel: tpu_custom_call.1
= control target key start
LH: loop header
LB: loop body
LE: loop exit
PB: predicated region body
PF: predicated region fallthrough
CT: control target
= control target key end

     0   :  { %vm290_vm0 = vcmask 1043456   ;;  %v28_v2 = vlaneseq  ;;  %v4939_v3 = vmov 0.0   ;;  %vm4940_vm1 = vmmov 0   ;;  %s6154_s0 = inlined_call_operand.vmem [shape: f32[4,128], index: 0, kind: input, shape index: {}]   ;;  %s6155_s1 = inlined_call_operand.vmem [shape: f32[5,8,4], index: 1, kind: input, shape index: {}]   ;;  %s6156_s2 = inlined_call_operand.vmem [shape: f32[8,1], index: 2, kind: input, shape index: {}]   ;;  %s6157_s3 = inlined_call_operand.vmem [shape: f32[3,8,8], index: 3, kind: input, shape index: {}]   ;;  %s6158_s4 = inlined_call_operand.vmem [shape: f32[8,1], index: 4, kind: input, shape index: {}]   ;;  %s6159_s5 = inlined_call_operand.vmem [shape: f32[3,3,8], index: 5, kind: input, shape index: {}]   ;;  %s6160_s6 = inlined_call_operand.vmem [shape: f32[3,1], index: 6, kind: input, shape index: {}]   ;;  %s6161_s7 = inlined_call_operand.hbm [shape: f32[3,384], index: 7, kind: output, shape index: {}]  }
   0x1   :  { %v4987_v0 = vld [vmem:[%s6154_s0] sm:$0xf]  ;;  %4815 = vmatprep.subr.mxu1 %v4939_v3  ;;  %4817 = vmatprep.mubr.msk.f32.mxu1 %vm4940_vm1, %v4939_v3  ;;  %vm286_vm2 = vcmask 31744  }
   0x2   :  { %v285_v1 = vld [vmem:[%s6155_s1] sm:$0xff] }
   0x3   :  { %12 = vsyncpa [#allocation3], 0  ;;  %4816 = vmatpush3.msk.msra.mxu1 %vm290_vm0, %v4987_v0  ;;  %v4997_v4 = vshrl.u32 %v28_v2, 7  ;;  %4825 = vmatprep.subr.mxu0 %v4939_v3  ;;  %v4222_v5 = vld [vmem:[%s6155_s1 + $0x8] sm:$0xff]  ;;  %v5021_v10 = vand.u32 127, %v28_v2  ;;  %v4941_v16 = vmov 1.0  }
   0x4   :  { %4818 = vmatmul.mubr.msk.f32.vlgmr.msra.gmra.mxu1 %vm286_vm2, %v285_v1  ;;  %4820 = vmatprep.subr.mxu1 %v4939_v3  ;;  %v4237_v24 = vld [vmem:[%s6155_s1 + $0x10] sm:$0xff]  ;;  %v4248_v25 = vld [vmem:[%s6155_s1 + $0x18] sm:$0xff]  ;;  %v4259_v42 = vld [vmem:[%s6155_s1 + $0x20] sm:$0xff]  ;;  %v4942_v49 = vmov 0  }
   0x5   :  { %4821 = vmatpush3.msk.msra.mxu1 %vm290_vm0, %v4987_v0  ;;  %4822 = vmatprep.mubr.msk.f32.mxu1 %vm4940_vm1, %v4939_v3  ;;  %v5010_v6 = vadd.s32 24, %v4997_v4  ;;  %v5013_v7 = vmul.u32 2, %v4997_v4  ;;  %v30_v9 = vadd.s32 8, %v4997_v4  ;;  %v1273_v48 = vld [vmem:[%s6156_s2] sm:$0xff]  ;;  %v5186_v59 = vadd.s32 64, %v4997_v4 }
   0x6   :  { %4836 = vmatprep.subr.mxu1 %v4939_v3  ;;  %4833 = vmatprep.mubr.msk.f32.mxu0 %vm4940_vm1, %v4939_v3  ;;  %v2204_v50 = vld [vmem:[%s6158_s4] sm:$0xff]  ;;  %v5189_v60 = vadd.s32 56, %v4997_v4  ;;  %v5194_v63 = vadd.s32 48, %v4997_v4 }
   0x7   :  { %v4199_v8 = vadd.s32 4294967280, %v5010_v6  ;;  %v5024_v12 = vadd.s32 36, %v5013_v7  ;;  %v5030_v14 = vmul.u32 2, %v30_v9  ;;  %vm6166_vm8 = vcmp.eq.s32.totalorder %v5021_v10, %v5013_v7  ;;  %4915 = vset.pattern.permute.xlu0 %v4942_v49  ;;  %4916 = vset.pattern.permute.xlu1 %v4942_v49 }
   0x8   :  { %4823 = vmatmul.mubr.msk.f32.vlgmr.msra.gmra.mxu1 %vm286_vm2, %v4222_v5  ;;  %v5067_v19 = vadd.s32 1, %v5013_v7  ;;  %v5120_v30 = vadd.s32 2, %v5013_v7  ;;  %v853_v33 = vadd.s32 3, %v5013_v7  ;;  %v1063_v47 = vadd.s32 4, %v5013_v7  ;;  %1276 = vperm.xlu0 %4915, %v1273_v48  }
   0x9   :  { %v192_v11 = vmul.u32 2, %v4199_v8  ;;  %4844 = vmatprep.mubr.msk.f32.mxu1 %vm4940_vm1, %v4939_v3  ;;  %vm239_vm4 = vcmp.eq.s32.totalorder %v5021_v10, %v5024_v12  ;;  %vm6167_vm6 = vcmp.eq.s32.totalorder %v5021_v10, %v5030_v14  ;;  %v366_v17 = vadd.s32 1, %v5024_v12 }
   0xa   :  { %v5056_v18 = vadd.s32 1, %v5030_v14  ;;  %vm380_vm10 = vcmp.eq.s32.totalorder %v5021_v10, %v5067_v19  ;;  %v645_v27 = vadd.s32 2, %v5024_v12  ;;  %v5111_v28 = vadd.s32 2, %v5030_v14 }
   0xb   :  { %v5028_v13 = vadd.s32 36, %v192_v11  ;;  %vm382_vm7 = vcmp.eq.s32.totalorder %v5021_v10, %v366_v17  ;;  %v855_v31 = vadd.s32 3, %v5024_v12  ;;  %vm6172_vm15 = vcmp.eq.s32.totalorder %v5021_v10, %v5120_v30 }
   0xc   :  { %vm381_vm9 = vcmp.eq.s32.totalorder %v5021_v10, %v5056_v18  ;;  %vm661_vm12 = vcmp.eq.s32.totalorder %v5021_v10, %v645_v27  ;;  %vm6174_vm13 = vcmp.eq.s32.totalorder %v5021_v10, %v5111_v28  ;;  %v854_v32 = vadd.s32 3, %v5030_v14  ;;  %2207 = vperm.xlu0 %4915, %v2204_v50  }
   0xd   :  { %vm240_vm3 = vcmp.eq.s32.totalorder %v5021_v10, %v5028_v13  ;;  %v367_v15 = vadd.s32 1, %v5028_v13  ;;  %v646_v26 = vadd.s32 2, %v5028_v13  ;;  %v856_v29 = vadd.s32 3, %v5028_v13 }
   0xe   :  { %4837 = vmatpush3.msk.msra.mxu1 %vm240_vm3, %v4941_v16  ;;  %vm871_vm3 = vcmp.eq.s32.totalorder %v5021_v10, %v855_v31  ;;  %v1066_v39 = vadd.s32 4, %v5028_v13  ;;  %v1065_v45 = vadd.s32 4, %v5024_v12  ;;  %v1064_v46 = vadd.s32 4, %v5030_v14 }
   0xf   :  { %4838 = vmatprep.subr.mxu1 %v4939_v3  ;;  %vm383_vm5 = vcmp.eq.s32.totalorder %v5021_v10, %v367_v15  ;;  %vm662_vm11 = vcmp.eq.s32.totalorder %v5021_v10, %v646_v26  ;;  %vm872_vm14 = vcmp.eq.s32.totalorder %v5021_v10, %v856_v29  ;;  %v4274_v61 = vadd.s32 4294967260, %v5186_v59 }
  0x10   :  { %4839 = vmatpush3.msk.msra.mxu1 %vm239_vm4, %v4941_v16  ;;  %4826 = vmatpush3.msk.msra.mxu0 %vm383_vm5, %v4941_v16  ;;  %vm870_vm4 = vcmp.eq.s32.totalorder %v5021_v10, %v854_v32  ;;  %vm869_vm5 = vcmp.eq.s32.totalorder %v5021_v10, %v853_v33  ;;  %v4273_v62 = vadd.s32 4294967260, %v5189_v60  ;;  %v4272_v2 = vadd.s32 4294967260, %v5194_v63 }
  0x11   :  { %4840 = vmatprep.subr.mxu1 %v4939_v3  ;;  %4827 = vmatprep.subr.mxu0 %v4939_v3  ;;  %v5198_v5 = vadd.s32 40, %v4997_v4  ;;  %v5206_v13 = vadd.s32 128, %v5021_v10  ;;  %v31_v27 = vadd.s32 16, %v4997_v4  ;;  %v5230_v29 = vmul.u32 2, %v5010_v6 }
  0x12   :  { %4841 = vmatpush3.msk.msra.mxu1 %vm6167_vm6, %v4941_v16  ;;  %4828 = vmatpush3.msk.msra.mxu0 %vm382_vm7, %v4941_v16  ;;  %vm1082_vm7 = vcmp.eq.s32.totalorder %v5021_v10, %v1066_v39  ;;  %v1403_v1 = vmul.u32 2, %v4273_v62  ;;  %v1402_v11 = vmul.u32 2, %v4272_v2 }
  0x13   :  { %4842 = vmatprep.subr.mxu1 %v4939_v3  ;;  %4829 = vmatprep.subr.mxu0 %v4939_v3  ;;  %v4271_v12 = vadd.s32 4294967260, %v5198_v5  ;;  %v5242_v6 = vadd.s32 1, %v5230_v29 }
  0x14   :  { %4843 = vmatpush3.msk.msra.mxu1 %vm6166_vm8, %v4941_v16  ;;  %4830 = vmatpush3.msk.msra.mxu0 %vm381_vm9, %v4941_v16  ;;  %v5202_v9 = vadd.s32 74, %v1403_v1  ;;  %v5209_v17 = vadd.s32 74, %v1402_v11 }
  0x15   :  { %4852 = vmatprep.subr.mxu1 %v4939_v3  ;;  %4831 = vmatprep.subr.mxu0 %v4939_v3 }
  0x16   :  { %4832 = vmatpush3.msk.msra.mxu0 %vm380_vm10, %v4941_v16  ;;  %v1951_v49 = vadd.s32 2, %v5202_v9  ;;  %v1950_v50 = vadd.s32 2, %v5209_v17 }
  0x17   :  { %4847 = vmatprep.subr.mxu0 %v4939_v3 }
  0xc4   :  { %v360_v20 = vpop.f32.mrf.mxu1 }
  0xc5   :  { %4845 = vmatmul.mubr.f32.vlgmr.msra.gmra.mxu1 %v360_v20  ;;  %v1622_v20 = vadd.s32 1, %v5202_v9 }
  0xc6   :  { %v4819_v21 = vpop.f32.mrf.mxu1  ;;  %4860 = vmatprep.mubr.msk.f32.mxu1 %vm4940_vm1, %v4939_v3  ;;  %4853 = vmatpush3.msk.msra.mxu1 %vm662_vm11, %v4941_v16  ;;  %vm1079_vm11 = vcmp.eq.s32.totalorder %v5021_v10, %v1063_v47  ;;  %v4319_v47 = vld [vmem:[%s6157_s3 + $0x8] sm:$0xff] }
  0xc7   :  { %4854 = vmatprep.subr.mxu1 %v4939_v3  ;;  %v33_v21 = vadd.s32 32, %v4997_v4 }
  0xc8   :  { %v499_v22 = vpop.f32.mrf.mxu1  ;;  %4855 = vmatpush3.msk.msra.mxu1 %vm661_vm12, %v4941_v16 }
  0xc9   :  { %4834 = vmatmul.mubr.f32.vlgmr.msra.gmra.mxu0 %v499_v22  ;;  %4856 = vmatprep.subr.mxu1 %v4939_v3  ;;  %v1401_v22 = vmul.u32 2, %v4271_v12  ;;  %v4270_v26 = vadd.s32 4294967260, %v33_v21 }
  0xca   :  { %v4824_v23 = vpop.f32.mrf.mxu1  ;;  %4848 = vmatpush3.msk.msra.mxu0 %vm290_vm0, %v4987_v0  ;;  %4849 = vmatprep.mubr.msk.f32.mxu0 %vm4940_vm1, %v4939_v3 }
  0xcb   :  { %4863 = vmatprep.subr.mxu0 %v4939_v3  ;;  %4857 = vmatpush3.msk.msra.mxu1 %vm6174_vm13, %v4941_v16  ;;  %v5219_v23 = vadd.s32 74, %v1401_v22  ;;  %v1400_v31 = vmul.u32 2, %v4270_v26  ;;  %v41_v22 = vadd.s32 96, %v4997_v4 }
  0xcc   :  { %4858 = vmatprep.subr.mxu1 %v4939_v3 }
  0xcd   :  { %4850 = vmatmul.mubr.msk.f32.vlgmr.msra.gmra.mxu0 %vm286_vm2, %v4237_v24  ;;  %4859 = vmatpush3.msk.msra.mxu1 %vm6172_vm15, %v4941_v16  ;;  %v1621_v24 = vadd.s32 1, %v5209_v17  ;;  %v1620_v32 = vadd.s32 1, %v5219_v23 }
  0xce   :  { %4864 = vmatpush3.msk.msra.mxu0 %vm290_vm0, %v4987_v0  ;;  %4865 = vmatprep.mubr.msk.f32.mxu0 %vm4940_vm1, %v4939_v3 }
  0xcf   :  { %4868 = vmatprep.subr.mxu0 %v4939_v3  ;;  %4879 = vmatprep.subr.mxu1 %v4939_v3 }
  0xd1   :  { %4866 = vmatmul.mubr.msk.f32.vlgmr.msra.gmra.mxu0 %vm286_vm2, %v4248_v25  ;;  %v5222_v25 = vmul.u32 2, %v33_v21 }
  0xd2   :  { %4876 = vmatprep.mubr.msk.f32.mxu0 %vm4940_vm1, %v4939_v3  ;;  %4869 = vmatpush3.msk.msra.mxu0 %vm872_vm14, %v4941_v16 }
  0xd3   :  { %4870 = vmatprep.subr.mxu0 %v4939_v3 }
  0xd4   :  { %4871 = vmatpush3.msk.msra.mxu0 %vm871_vm3, %v4941_v16  ;;  %vm1646_vm3 = vcmp.eq.s32.totalorder %v5206_v13, %v1622_v20 }
  0xd5   :  { %4872 = vmatprep.subr.mxu0 %v4939_v3 }
  0xd6   :  { %4873 = vmatpush3.msk.msra.mxu0 %vm870_vm4, %v4941_v16  ;;  %vm1645_vm4 = vcmp.eq.s32.totalorder %v5021_v10, %v1622_v20 }
  0xd7   :  { %4874 = vmatprep.subr.mxu0 %v4939_v3 }
  0xd8   :  { %4875 = vmatpush3.msk.msra.mxu0 %vm869_vm5, %v4941_v16  ;;  %vm1288_vm5 = vcmp.lt.s32.totalorder %v33_v21, 36 }
  0xd9   :  { %4895 = vmatprep.subr.mxu0 %v4939_v3  ;;  %v1320_v33 = vsel %vm1288_vm5, %v5222_v25, 4293918720  ;;  %vm6164_vm5 = vcmp.eq.s32.totalorder %v5021_v10, %v5242_v6 }
 0x185   :  { %v639_v34 = vpop.f32.mrf.mxu1 }
 0x187   :  { %v4846_v35 = vpop.f32.mrf.mxu1 }
 0x188   :  { %v1416_v35 = vadd.s32 74, %v1400_v31  ;;  %v4407_v31 = vadd.s32 4294967222, %v41_v22 }
 0x189   :  { %v569_v36 = vpop.f32.mrf.mxu0 }
 0x18a   :  { %v640_v37 = vadd.f32 %v639_v34, %v569_v36  ;;  %v5236_v34 = vmul.u32 2, %v31_v27 }
 0x18b   :  { %v4835_v38 = vpop.f32.mrf.mxu0 }
 0x18c   :  { %v5249_v38 = vadd.s32 1, %v5236_v34 }
 0x18d   :  { %v778_v40 = vpop.f32.mrf.mxu0 }
 0x18e   :  { %4861 = vmatmul.mubr.f32.vlgmr.msra.gmra.mxu1 %v778_v40 }
 0x18f   :  { %v4851_v41 = vpop.f32.mrf.mxu0  ;;  %4880 = vmatpush3.msk.msra.mxu1 %vm290_vm0, %v4987_v0  ;;  %4881 = vmatprep.mubr.msk.f32.mxu1 %vm4940_vm1, %v4939_v3  ;;  %vm1081_vm0 = vcmp.eq.s32.totalorder %v5021_v10, %v1065_v45  ;;  %v1404_v0 = vmul.u32 2, %v4274_v61  ;;  %v1540_v45 = vld [vmem:[%s6157_s3] sm:$0xff]  ;;  %v5431_v61 = vadd.s32 2, %v5236_v34 }
 0x190   :  { %4884 = vmatprep.subr.mxu1 %v4939_v3  ;;  %v1277_v41 = vpop.permute.xlu0 %1276 }
 0x191   :  { %v988_v43 = vpop.f32.mrf.mxu0  ;;  %v5200_v8 = vadd.s32 74, %v1404_v0 }
 0x192   :  { %4877 = vmatmul.mubr.f32.vlgmr.msra.gmra.mxu0 %v988_v43  ;;  %4882 = vmatmul.mubr.msk.f32.vlgmr.msra.gmra.mxu1 %vm286_vm2, %v4259_v42  ;;  %vm1080_vm2 = vcmp.eq.s32.totalorder %v5021_v10, %v1064_v46 }
 0x193   :  { %4885 = vmatpush3.msk.msra.mxu1 %vm1082_vm7, %v4941_v16  ;;  %v4867_v44 = vpop.f32.mrf.mxu0  ;;  %4892 = vmatprep.mubr.msk.f32.mxu1 %vm4940_vm1, %v4939_v3  ;;  %v1623_v15 = vadd.s32 1, %v5200_v8  ;;  %vm1644_vm7 = vcmp.eq.s32.totalorder %v5206_v13, %v1621_v24  ;;  %v1952_v48 = vadd.s32 2, %v5200_v8 }
 0x194   :  { %4886 = vmatprep.subr.mxu1 %v4939_v3  ;;  %4897 = vmatprep.mubr.msk.f32.mxu0 %vm4940_vm1, %v4939_v3 }
 0x195   :  { %4887 = vmatpush3.msk.msra.mxu1 %vm1081_vm0, %v4941_v16  ;;  %vm1648_vm12 = vcmp.eq.s32.totalorder %v5206_v13, %v1623_v15  ;;  %vm1647_vm14 = vcmp.eq.s32.totalorder %v5021_v10, %v1623_v15  ;;  %vm1643_vm0 = vcmp.eq.s32.totalorder %v5021_v10, %v1621_v24  ;;  %v42_v15 = vadd.s32 104, %v4997_v4 }
 0x196   :  { %4888 = vmatprep.subr.mxu1 %v4939_v3  ;;  %v5487_v24 = vadd.s32 256, %v5021_v10 }
 0x197   :  { %4889 = vmatpush3.msk.msra.mxu1 %vm1080_vm2, %v4941_v16  ;;  %vm1336_vm2 = vcmp.ge.s32.totalorder %v33_v21, 36  ;;  %v4408_v21 = vadd.s32 4294967222, %v42_v15 }
 0x198   :  { %4890 = vmatprep.subr.mxu1 %v4939_v3  ;;  %v5244_v36 = vsel %vm1336_vm2, %v1416_v35, %v1320_v33 }
 0x199   :  { %4891 = vmatpush3.msk.msra.mxu1 %vm1079_vm11, %v4941_v16  ;;  %vm1642_vm11 = vcmp.eq.s32.totalorder %v5206_v13, %v1620_v32  ;;  %v2504_v27 = vmul.u32 2, %v4408_v21 }
 0x19a   :  { %4321 = vmatprep.subr.msk.mxu1 %vm1648_vm12, %v4941_v16  ;;  %vm1641_vm12 = vcmp.eq.s32.totalorder %v5021_v10, %v1620_v32  ;;  %v40_v32 = vadd.s32 88, %v4997_v4 }
 0x24e   :  { %v848_v51 = vpop.f32.mrf.mxu1 }
 0x24f   :  { %v852_v52 = vadd.f32 %v848_v51, %v640_v37  ;;  %v1619_v37 = vadd.s32 1, %v5244_v36 }
 0x250   :  { %v4862_v53 = vpop.f32.mrf.mxu1 }
 0x252   :  { %v1058_v54 = vpop.f32.mrf.mxu0  ;;  %v1198_v55 = vpop.f32.mrf.mxu1 }
 0x253   :  { %v5182_v56 = vadd.f32 %v1058_v54, %v852_v52  ;;  %4893 = vmatmul.mubr.f32.vlgmr.msra.gmra.mxu1 %v1198_v55  ;;  %v1949_v52 = vadd.s32 2, %v5219_v23  ;;  %v1948_v54 = vadd.s32 2, %v5244_v36 }
 0x254   :  { %v4883_v57 = vpop.f32.mrf.mxu1  ;;  %v4878_v58 = vpop.f32.mrf.mxu0  ;;  %1866 = vmatprep.mubr.f32.mxu1 %v4939_v3  ;;  %4322 = vmatpush1.msk.msra.mxu1 %vm1647_vm14, %v4941_v16  ;;  %vm1640_vm14 = vcmp.eq.s32.totalorder %v5206_v13, %v1619_v37 }
 0x255   :  { %4323 = vmatprep.subr.msk.mxu1 %vm1646_vm3, %v4941_v16  ;;  %vm1639_vm3 = vcmp.eq.s32.totalorder %v5021_v10, %v1619_v37  ;;  %v4375_v57 = vld [vmem:[%s6157_s3 + $0x10] sm:$0xff]  ;;  %v5424_v58 = vadd.s32 2, %v5230_v29  ;;  %v2503_v37 = vmul.u32 2, %v4407_v31  ;;  %v2208_v31 = vpop.permute.xlu0 %2207 }
 0x256   :  { %4324 = vmatpush1.msk.msra.mxu1 %vm1645_vm4, %v4941_v16  ;;  %vm1638_vm4 = vcmp.eq.s32.totalorder %v5206_v13, %v5242_v6 }
 0x257   :  { %4325 = vmatprep.subr.msk.mxu1 %vm1644_vm7, %v4941_v16  ;;  %vm6163_vm7 = vcmp.eq.s32.totalorder %v5206_v13, %v5249_v38 }
 0x258   :  { %4326 = vmatpush1.msk.msra.mxu1 %vm1643_vm0, %v4941_v16  ;;  %vm6162_vm0 = vcmp.eq.s32.totalorder %v5021_v10, %v5249_v38 }
 0x259   :  { %4327 = vmatprep.subr.msk.mxu1 %vm1642_vm11, %v4941_v16  ;;  %vm1541_vm11 = vcmask 64512  }
 0x25a   :  { %4328 = vmatpush1.msk.msra.mxu1 %vm1641_vm12, %v4941_v16  ;;  %vm1461_vm12 = vcmp.eq.s32.totalorder %v5206_v13, %v5200_v8 }
 0x25b   :  { %4329 = vmatprep.subr.msk.mxu1 %vm1640_vm14, %v4941_v16  ;;  %vm1460_vm14 = vcmp.eq.s32.totalorder %v5021_v10, %v5200_v8  ;;  %v44_v8 = vadd.s32 120, %v4997_v4 }
 0x25c   :  { %4330 = vmatpush1.msk.msra.mxu1 %vm1639_vm3, %v4941_v16  ;;  %vm1459_vm3 = vcmp.eq.s32.totalorder %v5206_v13, %v5202_v9 }
 0x25d   :  { %4331 = vmatprep.subr.msk.mxu1 %vm1638_vm4, %v4941_v16  ;;  %v4410_v11 = vadd.s32 4294967222, %v44_v8  ;;  %v5557_v8 = vmul.u32 2, %v5198_v5 }
 0x25e   :  { %4332 = vmatpush1.msk.msra.mxu1 %vm6164_vm5, %v4941_v16  ;;  %vm1453_vm5 = vcmp.eq.s32.totalorder %v5206_v13, %v5244_v36 }
 0x25f   :  { %4333 = vmatprep.subr.msk.mxu1 %vm6163_vm7, %v4941_v16  ;;  %vm1455_vm7 = vcmp.eq.s32.totalorder %v5206_v13, %v5219_v23  ;;  %v5579_v5 = vadd.s32 1, %v5557_v8 }
 0x260   :  { %4334 = vmatpush1.msk.msra.mxu1 %vm6162_vm0, %v4941_v16  ;;  %vm1457_vm0 = vcmp.eq.s32.totalorder %v5206_v13, %v5209_v17 }
 0x313   :  { %v1268_v39 = vpop.f32.mrf.mxu1 }
 0x314   :  { %v1272_v40 = vadd.f32 %v1268_v39, %v5182_v56  ;;  %v4406_v39 = vadd.s32 4294967222, %v40_v32 }
 0x315   :  { %v4894_v42 = vpop.f32.mrf.mxu1 }
 0x316   :  { %v1279_v43 = vadd.f32 %v1277_v41, %v1272_v40  ;;  %v39_v40 = vadd.s32 80, %v4997_v4  ;;  %v5510_v42 = vadd.s32 149, %v2503_v37 }
 0x318   :  { %v1281_v44 = vmul.f32 0.2, %v1279_v43  ;;  %vm1280_vm2 = vcmp.ge.f32.partialorder %v1279_v43, 0.0 }
 0x31a   :  { %v5283_v46 = vsel %vm1280_vm2, %v1279_v43, %v1281_v44  ;;  %vm1458_vm2 = vcmp.eq.s32.totalorder %v5021_v10, %v5202_v9  ;;  %v43_v9 = vadd.s32 112, %v4997_v4  ;;  %v2502_v43 = vmul.u32 2, %v4406_v39 }
 0x31b   :  { %4896 = vmatpush3.msra.mxu0 %v5283_v46  ;;  %v4405_v44 = vadd.s32 4294967222, %v39_v40 }
 0x31c   :  { %4898 = vmatmul.mubr.msk.f32.vlgmr.msra.gmra.mxu0 %vm1541_vm11, %v1540_v45  ;;  %4900 = vmatprep.subr.mxu0 %v4939_v3  ;;  %v4409_v12 = vadd.s32 4294967222, %v43_v9  ;;  %v38_v45 = vadd.s32 72, %v4997_v4 }
 0x31d   :  { %4901 = vmatpush3.msra.mxu0 %v5283_v46  ;;  %4902 = vmatprep.mubr.msk.f32.mxu0 %vm4940_vm1, %v4939_v3 }
 0x31e   :  { %4339 = vmatprep.subr.msk.mxu0 %vm1461_vm12, %v4941_v16  ;;  %vm1456_vm12 = vcmp.eq.s32.totalorder %v5021_v10, %v5209_v17  ;;  %v2506_v17 = vmul.u32 2, %v4410_v11  ;;  %v2505_v20 = vmul.u32 2, %v4409_v12  ;;  %v5586_v12 = vadd.s32 1, %v5222_v25 }
 0x320   :  { %4903 = vmatmul.mubr.msk.f32.vlgmr.msra.gmra.mxu0 %vm1541_vm11, %v4319_v47  ;;  %v5489_v26 = vadd.s32 149, %v2505_v20  ;;  %v5520_v47 = vadd.s32 149, %v2502_v43 }
 0x321   :  { %4340 = vmatpush1.msk.msra.mxu0 %vm1460_vm14, %v4941_v16  ;;  %1937 = vmatprep.mubr.f32.mxu0 %v4939_v3  ;;  %vm1454_vm14 = vcmp.eq.s32.totalorder %v5021_v10, %v5219_v23  ;;  %v5484_v23 = vadd.s32 149, %v2506_v17 }
 0x322   :  { %4341 = vmatprep.subr.msk.mxu0 %vm1459_vm3, %v4941_v16  ;;  %vm1452_vm3 = vcmp.eq.s32.totalorder %v5021_v10, %v5244_v36  ;;  %v5496_v35 = vadd.s32 1, %v5489_v26  ;;  %v5498_v36 = vadd.s32 149, %v2504_v27 }
 0x323   :  { %4342 = vmatpush1.msk.msra.mxu0 %vm1458_vm2, %v4941_v16  ;;  %vm1451_vm2 = vcmp.eq.s32.totalorder %v5206_v13, %v5230_v29  ;;  %v5493_v33 = vadd.s32 1, %v5484_v23 }
 0x324   :  { %4343 = vmatprep.subr.msk.mxu0 %vm1457_vm0, %v4941_v16  ;;  %vm6171_vm0 = vcmp.eq.s32.totalorder %v5021_v10, %v5230_v29  ;;  %v5507_v41 = vadd.s32 1, %v5498_v36 }
 0x325   :  { %4344 = vmatpush1.msk.msra.mxu0 %vm1456_vm12, %v4941_v16  ;;  %vm6170_vm12 = vcmp.eq.s32.totalorder %v5206_v13, %v5236_v34 }
 0x326   :  { %4345 = vmatprep.subr.msk.mxu0 %vm1455_vm7, %v4941_v16  ;;  %vm6169_vm7 = vcmp.eq.s32.totalorder %v5021_v10, %v5236_v34 }
 0x327   :  { %4346 = vmatpush1.msk.msra.mxu0 %vm1454_vm14, %v4941_v16  ;;  %vm6165_vm14 = vcmp.eq.s32.totalorder %v5206_v13, %v5013_v7 }
 0x328   :  { %4347 = vmatprep.subr.msk.mxu0 %vm1453_vm5, %v4941_v16  ;;  %vm6168_vm5 = vcmp.eq.s32.totalorder %v5206_v13, %v5030_v14 }
 0x329   :  { %4348 = vmatpush1.msk.msra.mxu0 %vm1452_vm3, %v4941_v16  ;;  %vm1634_vm3 = vcmp.eq.s32.totalorder %v5206_v13, %v5056_v18 }
 0x32a   :  { %4349 = vmatprep.subr.msk.mxu0 %vm1451_vm2, %v4941_v16  ;;  %4335 = vmatprep.subr.msk.mxu1 %vm1634_vm3, %v4941_v16 }
 0x32b   :  { %4350 = vmatpush1.msk.msra.mxu0 %vm6171_vm0, %v4941_v16  ;;  %4336 = vmatpush1.msk.msra.mxu1 %vm381_vm9, %v4941_v16  ;;  %vm1971_vm0 = vcmp.eq.s32.totalorder %v5206_v13, %v1949_v52 }
 0x32c   :  { %4351 = vmatprep.subr.msk.mxu0 %vm6170_vm12, %v4941_v16  ;;  %vm1973_vm12 = vcmp.eq.s32.totalorder %v5206_v13, %v1950_v50 }
 0x32d   :  { %4352 = vmatpush1.msk.msra.mxu0 %vm6169_vm7, %v4941_v16  ;;  %vm1974_vm7 = vcmp.eq.s32.totalorder %v5021_v10, %v1951_v49 }
 0x32e   :  { %4353 = vmatprep.subr.msk.mxu0 %vm6168_vm5, %v4941_v16  ;;  %vm1975_vm5 = vcmp.eq.s32.totalorder %v5206_v13, %v1951_v49  ;;  %v104_v49 = vmul.u32 2, %v38_v45 }
 0x32f   :  { %4354 = vmatpush1.msk.msra.mxu0 %vm6167_vm6, %v4941_v16  ;;  %vm1976_vm6 = vcmp.eq.s32.totalorder %v5021_v10, %v1952_v48 }
 0x330   :  { %4355 = vmatprep.subr.msk.mxu0 %vm6165_vm14, %v4941_v16  ;;  %vm1632_vm14 = vcmp.eq.s32.totalorder %v5206_v13, %v5067_v19 }
 0x331   :  { %4356 = vmatpush1.msk.msra.mxu0 %vm6166_vm8, %v4941_v16  ;;  %4337 = vmatprep.subr.msk.mxu1 %vm1632_vm14, %v4941_v16  ;;  %vm1977_vm8 = vcmp.eq.s32.totalorder %v5206_v13, %v1952_v48  ;;  %v2501_v48 = vmul.u32 2, %v4405_v44 }
 0x332   :  { %4338 = vmatpush1.msk.msra.mxu1 %vm380_vm10, %v4941_v16  ;;  %4377 = vmatprep.subr.msk.mxu0 %vm1977_vm8, %v4941_v16  ;;  %vm1972_vm8 = vcmp.eq.s32.totalorder %v5021_v10, %v1950_v50  ;;  %v4404_v50 = vadd.s32 4294967222, %v38_v45 }
 0x333   :  { %4905 = vmatprep.subr.mxu1 %v4939_v3 }
 0x3dc   :  { %v1611_v51 = vpop.f32.mrf.mxu0 }
 0x3dd   :  { %1938 = vmatmul.mubr.f32.vlgmr.msra.gmra.mxu0 %v1611_v51  ;;  %v5524_v51 = vmul.u32 2, %v5186_v59 }
 0x3de   :  { %v4899_v53 = vpop.f32.mrf.mxu0  ;;  %4378 = vmatpush1.msk.msra.mxu0 %vm1976_vm6, %v4941_v16  ;;  %2195 = vmatprep.mubr.f32.mxu0 %v4939_v3  ;;  %vm1970_vm6 = vcmp.eq.s32.totalorder %v5021_v10, %v1949_v52  ;;  %v5530_v52 = vadd.s32 1, %v5520_v47 }
 0x3df   :  { %4379 = vmatprep.subr.msk.mxu0 %vm1975_vm5, %v4941_v16  ;;  %vm6177_vm5 = vcmp.eq.s32.totalorder %v5206_v13, %v5431_v61  ;;  %v5533_v53 = vadd.s32 149, %v2501_v48  ;;  %v2875_v48 = vld [vmem:[%s6159_s5] sm:$0x7] }
 0x3e0   :  { %v1798_v55 = vpop.f32.mrf.mxu0  ;;  %4380 = vmatpush1.msk.msra.mxu0 %vm1974_vm7, %v4941_v16  ;;  %vm1969_vm7 = vcmp.eq.s32.totalorder %v5206_v13, %v1948_v54 }
 0x3e1   :  { %1867 = vmatmul.mubr.f32.vlgmr.msra.gmra.mxu1 %v1798_v55  ;;  %4381 = vmatprep.subr.msk.mxu0 %vm1973_vm12, %v4941_v16  ;;  %vm1967_vm12 = vcmp.eq.s32.totalorder %v5206_v13, %v5424_v58  ;;  %v5536_v55 = vmul.u32 2, %v5189_v60  ;;  %v5550_v60 = vadd.s32 1, %v5524_v51 }
 0x3e2   :  { %4906 = vmatpush3.msra.mxu1 %v5283_v46  ;;  %v4904_v56 = vpop.f32.mrf.mxu0  ;;  %4907 = vmatprep.mubr.msk.f32.mxu1 %vm4940_vm1, %v4939_v3  ;;  %vm1968_vm1 = vcmp.eq.s32.totalorder %v5021_v10, %v1948_v54  ;;  %v5518_v46 = vadd.s32 1, %v5510_v42  ;;  %v2500_v54 = vmul.u32 2, %v4404_v50 }
 0x3e3   :  { %4382 = vmatpush1.msk.msra.mxu0 %vm1972_vm8, %v4941_v16  ;;  %vm6176_vm8 = vcmp.eq.s32.totalorder %v5021_v10, %v5431_v61  ;;  %v5543_v56 = vadd.s32 1, %v5533_v53 }
 0x3e4   :  { %4383 = vmatprep.subr.msk.mxu0 %vm1971_vm0, %v4941_v16  ;;  %vm1966_vm0 = vcmp.eq.s32.totalorder %v5021_v10, %v5424_v58 }
 0x3e5   :  { %4908 = vmatmul.mubr.msk.f32.vlgmr.msra.gmra.mxu1 %vm1541_vm11, %v4375_v57  ;;  %4384 = vmatpush1.msk.msra.mxu0 %vm1970_vm6, %v4941_v16  ;;  %vm6175_vm6 = vcmp.eq.s32.totalorder %v5206_v13, %v5111_v28  ;;  %v2532_v57 = vadd.s32 149, %v2500_v54 }
 0x3e6   :  { %4385 = vmatprep.subr.msk.mxu0 %vm1969_vm7, %v4941_v16  ;;  %2943 = vmatprep.mubr.f32.mxu1 %v4939_v3  ;;  %vm6173_vm7 = vcmp.eq.s32.totalorder %v5206_v13, %v5120_v30 }
 0x3e7   :  { %4386 = vmatpush1.msk.msra.mxu0 %vm1968_vm1, %v4941_v16  ;;  %vm3029_vm1 = vcmp.eq.s32.totalorder %v5487_v24, %v5493_v33 }
 0x3e8   :  { %4387 = vmatprep.subr.msk.mxu0 %vm1967_vm12, %v4941_v16 }
 0x3e9   :  { %4388 = vmatpush1.msk.msra.mxu0 %vm1966_vm0, %v4941_v16 }
 0x3ea   :  { %4389 = vmatprep.subr.msk.mxu0 %vm6177_vm5, %v4941_v16  ;;  %vm3018_vm5 = vcmp.eq.s32.totalorder %v5021_v10, %v5518_v46 }
 0x3eb   :  { %4390 = vmatpush1.msk.msra.mxu0 %vm6176_vm8, %v4941_v16  ;;  %vm3019_vm8 = vcmp.eq.s32.totalorder %v5206_v13, %v5518_v46 }
 0x3ec   :  { %4391 = vmatprep.subr.msk.mxu0 %vm6175_vm6, %v4941_v16  ;;  %vm2993_vm6 = vcmp.eq.s32.totalorder %v5487_v24, %v5242_v6 }
 0x3ed   :  { %4392 = vmatpush1.msk.msra.mxu0 %vm6174_vm13, %v4941_v16  ;;  %vm2372_vm13 = vcmp.ge.s32.totalorder %v38_v45, 74 }
 0x3ee   :  { %4393 = vmatprep.subr.msk.mxu0 %vm6173_vm7, %v4941_v16  ;;  %vm3023_vm7 = vcmp.eq.s32.totalorder %v5487_v24, %v5507_v41 }
 0x3ef   :  { %4394 = vmatpush1.msk.msra.mxu0 %vm6172_vm15, %v4941_v16  ;;  %vm3026_vm15 = vcmp.eq.s32.totalorder %v5487_v24, %v5496_v35 }
 0x3f0   :  { %3417 = vmatprep.subr.mxu0 %v4939_v3 }
 0x49d   :  { %v1939_v15 = vpop.f32.mrf.mxu0 }
 0x49f   :  { %v1941_v17 = vpop.f32.mrf.mxu0 }
 0x4a1   :  { %v5476_v62 = vpop.f32.mrf.mxu1 }
 0x4a2   :  { %v1940_v20 = vadd.f32 %v1939_v15, %v5476_v62 }
 0x4a3   :  { %v5478_v0 = vpop.f32.mrf.mxu1 }
 0x4a4   :  { %v1942_v22 = vadd.f32 %v1941_v17, %v5478_v0  ;;  %v4542_v0 = vld [vmem:[%s6159_s5 + $0x4] sm:$0x7] }
 0x4a5   :  { %v2127_v1 = vpop.f32.mrf.mxu1 }
 0x4a6   :  { %2196 = vmatmul.mubr.f32.vlgmr.msra.gmra.mxu0 %v2127_v1  ;;  %v5546_v1 = vmul.u32 2, %v5194_v63  ;;  %v5564_v63 = vadd.s32 1, %v5536_v55 }
 0x4a7   :  { %v4909_v2 = vpop.f32.mrf.mxu1  ;;  %4582 = vmatpush1.msk.msra.mxu0 %vm3029_vm1, %v4941_v16  ;;  %vm2260_vm1 = vcmp.lt.s32.totalorder %v38_v45, 74 }
 0x4a8   :  { %3419 = vmatprep.subr.mxu0 %v4939_v3  ;;  %v2340_v59 = vsel %vm2260_vm1, %v104_v49, 4293918720  ;;  %v5572_v11 = vadd.s32 1, %v5546_v1 }
 0x4a9   :  { %4583 = vmatpush1.msk.msra.mxu0 %vm3026_vm15, %v4941_v16  ;;  %vm3020_vm15 = vcmp.eq.s32.totalorder %v5487_v24, %v5518_v46  ;;  %v5554_v2 = vsel %vm2372_vm13, %v2532_v57, %v2340_v59  ;;  %vm3008_vm13 = vcmp.eq.s32.totalorder %v5487_v24, %v5550_v60 }
 0x4aa   :  { %3421 = vmatprep.subr.mxu0 %v4939_v3  ;;  %v5561_v9 = vadd.s32 1, %v5554_v2 }
 0x4ab   :  { %4584 = vmatpush1.msk.msra.mxu0 %vm3023_vm7, %v4941_v16  ;;  %vm3017_vm7 = vcmp.eq.s32.totalorder %v5487_v24, %v5530_v52 }
 0x4ac   :  { %3423 = vmatprep.subr.mxu0 %v4939_v3  ;;  %vm3011_vm1 = vcmp.eq.s32.totalorder %v5487_v24, %v5561_v9 }
 0x4ad   :  { %4585 = vmatpush1.msk.msra.mxu0 %vm3020_vm15, %v4941_v16  ;;  %vm3014_vm15 = vcmp.eq.s32.totalorder %v5487_v24, %v5543_v56 }
 0x4ae   :  { %3425 = vmatprep.subr.mxu0 %v4939_v3 }
 0x4af   :  { %4586 = vmatpush1.msk.msra.mxu0 %vm3017_vm7, %v4941_v16  ;;  %vm3005_vm7 = vcmp.eq.s32.totalorder %v5487_v24, %v5564_v63 }
 0x4b0   :  { %3427 = vmatprep.subr.mxu0 %v4939_v3 }
 0x4b1   :  { %4587 = vmatpush1.msk.msra.mxu0 %vm3014_vm15, %v4941_v16  ;;  %vm3002_vm15 = vcmp.eq.s32.totalorder %v5487_v24, %v5572_v11 }
 0x4b2   :  { %3429 = vmatprep.subr.mxu0 %v4939_v3 }
 0x4b3   :  { %4588 = vmatpush1.msk.msra.mxu0 %vm3011_vm1, %v4941_v16  ;;  %vm2999_vm1 = vcmp.eq.s32.totalorder %v5487_v24, %v5579_v5 }
 0x4b4   :  { %3431 = vmatprep.subr.mxu0 %v4939_v3 }
 0x4b5   :  { %4589 = vmatpush1.msk.msra.mxu0 %vm3008_vm13, %v4941_v16  ;;  %vm2996_vm13 = vcmp.eq.s32.totalorder %v5487_v24, %v5586_v12 }
 0x4b6   :  { %3433 = vmatprep.subr.mxu0 %v4939_v3 }
 0x4b7   :  { %4590 = vmatpush1.msk.msra.mxu0 %vm3005_vm7, %v4941_v16  ;;  %vm2990_vm7 = vcmp.eq.s32.totalorder %v5487_v24, %v5249_v38 }
 0x4b8   :  { %3435 = vmatprep.subr.mxu0 %v4939_v3 }
 0x4b9   :  { %4591 = vmatpush1.msk.msra.mxu0 %vm3002_vm15, %v4941_v16  ;;  %vm2987_vm15 = vcmp.eq.s32.totalorder %v5487_v24, %v5056_v18  ;;  %v2218_v18 = vadd.s32 128, %v4997_v4 }
 0x4ba   :  { %3437 = vmatprep.subr.mxu0 %v4939_v3 }
 0x4bb   :  { %4592 = vmatpush1.msk.msra.mxu0 %vm2999_vm1, %v4941_v16  ;;  %v4411_v50 = vadd.s32 4294967222, %v2218_v18 }
 0x4bc   :  { %3439 = vmatprep.subr.mxu0 %v4939_v3 }
 0x4bd   :  { %4593 = vmatpush1.msk.msra.mxu0 %vm2996_vm13, %v4941_v16  ;;  %vm3028_vm13 = vcmp.eq.s32.totalorder %v5206_v13, %v5493_v33 }
 0x4be   :  { %3441 = vmatprep.subr.mxu0 %v4939_v3 }
 0x4bf   :  { %4594 = vmatpush1.msk.msra.mxu0 %vm2993_vm6, %v4941_v16 }
 0x4c0   :  { %3443 = vmatprep.subr.mxu0 %v4939_v3 }
 0x4c1   :  { %4595 = vmatpush1.msk.msra.mxu0 %vm2990_vm7, %v4941_v16  ;;  %vm3027_vm7 = vcmp.eq.s32.totalorder %v5021_v10, %v5493_v33  ;;  %v2219_v33 = vadd.s32 136, %v4997_v4 }
 0x4c2   :  { %3445 = vmatprep.subr.mxu0 %v4939_v3 }
 0x4c3   :  { %4596 = vmatpush1.msk.msra.mxu0 %vm2987_vm15, %v4941_v16  ;;  %vm3025_vm15 = vcmp.eq.s32.totalorder %v5206_v13, %v5496_v35 }
 0x4c4   :  { %3447 = vmatprep.subr.mxu0 %v4939_v3 }
 0x566   :  { %v2197_v21 = vpop.f32.mrf.mxu0 }
 0x567   :  { %v2202_v27 = vadd.f32 %v2197_v21, %v1940_v20 }
 0x568   :  { %v2199_v32 = vpop.f32.mrf.mxu0 }
 0x569   :  { %v2210_v37 = vadd.f32 %v2208_v31, %v2202_v27  ;;  %v2203_v39 = vadd.f32 %v2199_v32, %v1942_v22 }
 0x56b   :  { %v2211_v40 = vadd.f32 %v2208_v31, %v2203_v39  ;;  %v2214_v43 = vmul.f32 0.2, %v2210_v37  ;;  %vm2212_vm1 = vcmp.ge.f32.partialorder %v2210_v37, 0.0 }
 0x56d   :  { %vm2213_vm6 = vcmp.ge.f32.partialorder %v2211_v40, 0.0  ;;  %v2215_v44 = vmul.f32 0.2, %v2211_v40  ;;  %v5620_v62 = vsel %vm2212_vm1, %v2210_v37, %v2214_v43  ;;  %vm3022_vm1 = vcmp.eq.s32.totalorder %v5206_v13, %v5507_v41 }
 0x56f   :  { %v5614_v45 = vsel %vm2213_vm6, %v2211_v40, %v2215_v44  ;;  %vm3024_vm6 = vcmp.eq.s32.totalorder %v5021_v10, %v5496_v35 }
 0x570   :  { %2909 = vmatprep.subr.mxu1 %v5614_v45 }
 0x571   :  { %2910 = vmatpush1.msra.mxu1 %v5620_v62 }
 0x572   :  { %4484 = vmatmul.mubr.msk.f32.vlgmr.msra.gmra.mxu1 %vm1541_vm11, %v2875_v48  ;;  %3305 = vmatprep.subr.mxu1 %v5614_v45 }
 0x573   :  { %3306 = vmatpush1.msra.mxu1 %v5620_v62  ;;  %3339 = vmatprep.mubr.f32.mxu1 %v4939_v3 }
 0x574   :  { %4544 = vmatprep.subr.msk.mxu1 %vm3028_vm13, %v4941_v16  ;;  %vm3021_vm13 = vcmp.eq.s32.totalorder %v5021_v10, %v5507_v41  ;;  %v4412_v41 = vadd.s32 4294967222, %v2219_v33 }
 0x576   :  { %4543 = vmatmul.mubr.msk.f32.vlgmr.msra.gmra.mxu1 %vm1541_vm11, %v4542_v0  ;;  %v2508_v49 = vmul.u32 2, %v4412_v41 }
 0x577   :  { %4545 = vmatpush1.msk.msra.mxu1 %vm3027_vm7, %v4941_v16  ;;  %vm3016_vm7 = vcmp.eq.s32.totalorder %v5206_v13, %v5530_v52 }
 0x578   :  { %4546 = vmatprep.subr.msk.mxu1 %vm3025_vm15, %v4941_v16  ;;  %vm3015_vm15 = vcmp.eq.s32.totalorder %v5021_v10, %v5530_v52  ;;  %v5741_v59 = vadd.s32 149, %v2508_v49 }
 0x579   :  { %4547 = vmatpush1.msk.msra.mxu1 %vm3024_vm6, %v4941_v16  ;;  %vm3013_vm6 = vcmp.eq.s32.totalorder %v5206_v13, %v5543_v56 }
 0x57a   :  { %4548 = vmatprep.subr.msk.mxu1 %vm3022_vm1, %v4941_v16  ;;  %vm3012_vm1 = vcmp.eq.s32.totalorder %v5021_v10, %v5543_v56  ;;  %v2507_v56 = vmul.u32 2, %v4411_v50 }
 0x57b   :  { %4549 = vmatpush1.msk.msra.mxu1 %vm3021_vm13, %v4941_v16  ;;  %vm3010_vm13 = vcmp.eq.s32.totalorder %v5206_v13, %v5561_v9 }
 0x57c   :  { %4550 = vmatprep.subr.msk.mxu1 %vm3019_vm8, %v4941_v16  ;;  %vm3009_vm8 = vcmp.eq.s32.totalorder %v5021_v10, %v5561_v9  ;;  %v5748_v57 = vadd.s32 149, %v2507_v56 }
 0x57d   :  { %4551 = vmatpush1.msk.msra.mxu1 %vm3018_vm5, %v4941_v16  ;;  %vm3007_vm5 = vcmp.eq.s32.totalorder %v5206_v13, %v5550_v60 }
 0x57e   :  { %4552 = vmatprep.subr.msk.mxu1 %vm3016_vm7, %v4941_v16  ;;  %vm3006_vm7 = vcmp.eq.s32.totalorder %v5021_v10, %v5550_v60 }
 0x57f   :  { %4553 = vmatpush1.msk.msra.mxu1 %vm3015_vm15, %v4941_v16  ;;  %vm3004_vm15 = vcmp.eq.s32.totalorder %v5206_v13, %v5564_v63 }
 0x580   :  { %4554 = vmatprep.subr.msk.mxu1 %vm3013_vm6, %v4941_v16  ;;  %vm3003_vm6 = vcmp.eq.s32.totalorder %v5021_v10, %v5564_v63 }
 0x581   :  { %4555 = vmatpush1.msk.msra.mxu1 %vm3012_vm1, %v4941_v16  ;;  %vm3001_vm1 = vcmp.eq.s32.totalorder %v5206_v13, %v5572_v11 }
 0x582   :  { %4556 = vmatprep.subr.msk.mxu1 %vm3010_vm13, %v4941_v16  ;;  %vm3000_vm13 = vcmp.eq.s32.totalorder %v5021_v10, %v5572_v11 }
 0x583   :  { %4557 = vmatpush1.msk.msra.mxu1 %vm3009_vm8, %v4941_v16  ;;  %vm2998_vm8 = vcmp.eq.s32.totalorder %v5206_v13, %v5579_v5 }
 0x584   :  { %4558 = vmatprep.subr.msk.mxu1 %vm3007_vm5, %v4941_v16  ;;  %vm2997_vm5 = vcmp.eq.s32.totalorder %v5021_v10, %v5579_v5  ;;  %v3640_v5 = vadd.s32 2, %v5510_v42 }
 0x585   :  { %4559 = vmatpush1.msk.msra.mxu1 %vm3006_vm7, %v4941_v16  ;;  %vm2995_vm7 = vcmp.eq.s32.totalorder %v5206_v13, %v5586_v12 }
 0x586   :  { %4560 = vmatprep.subr.msk.mxu1 %vm3004_vm15, %v4941_v16  ;;  %vm2994_vm15 = vcmp.eq.s32.totalorder %v5021_v10, %v5586_v12 }
 0x587   :  { %4561 = vmatpush1.msk.msra.mxu1 %vm3003_vm6, %v4941_v16  ;;  %vm6178_vm6 = vcmp.eq.s32.totalorder %v5021_v10, %v5242_v6  ;;  %v2220_v6 = vadd.s32 144, %v4997_v4  ;;  %v2967_v4 = vadd.s32 1, %v5741_v59 }
 0x588   :  { %4562 = vmatprep.subr.msk.mxu1 %vm3001_vm1, %v4941_v16  ;;  %vm6179_vm1 = vcmp.eq.s32.totalorder %v5206_v13, %v5249_v38 }
 0x589   :  { %4563 = vmatpush1.msk.msra.mxu1 %vm3000_vm13, %v4941_v16  ;;  %vm6180_vm13 = vcmp.eq.s32.totalorder %v5021_v10, %v5249_v38  ;;  %v4413_v38 = vadd.s32 4294967222, %v2220_v6 }
 0x58a   :  { %4564 = vmatprep.subr.msk.mxu1 %vm2998_vm8, %v4941_v16  ;;  %vm3034_vm8 = vcmp.eq.s32.totalorder %v5206_v13, %v2967_v4 }
 0x58b   :  { %4565 = vmatpush1.msk.msra.mxu1 %vm2997_vm5, %v4941_v16  ;;  %v2509_v35 = vmul.u32 2, %v4413_v38  ;;  %vm3033_vm5 = vcmp.eq.s32.totalorder %v5021_v10, %v2967_v4 }
 0x58c   :  { %4566 = vmatprep.subr.msk.mxu1 %vm2995_vm7, %v4941_v16  ;;  %vm3035_vm7 = vcmp.eq.s32.totalorder %v5487_v24, %v2967_v4 }
 0x58d   :  { %4567 = vmatpush1.msk.msra.mxu1 %vm2994_vm15, %v4941_v16  ;;  %v2541_v46 = vadd.s32 149, %v2509_v35 }
 0x58e   :  { %4568 = vmatprep.subr.msk.mxu1 %vm1638_vm4, %v4941_v16 }
 0x58f   :  { %4569 = vmatpush1.msk.msra.mxu1 %vm6178_vm6, %v4941_v16 }
 0x590   :  { %4570 = vmatprep.subr.msk.mxu1 %vm6179_vm1, %v4941_v16 }
 0x591   :  { %4571 = vmatpush1.msk.msra.mxu1 %vm6180_vm13, %v4941_v16  ;;  %vm2633_vm13 = vcmp.eq.s32.totalorder %v5206_v13, %v5484_v23 }
 0x592   :  { %4572 = vmatprep.subr.msk.mxu1 %vm1634_vm3, %v4941_v16 }
 0x593   :  { %4573 = vmatpush1.msk.msra.mxu1 %vm381_vm9, %v4941_v16  ;;  %vm2413_vm9 = vcmp.lt.s32.totalorder %v2220_v6, 148 }
 0x594   :  { %4574 = vmatprep.subr.msk.mxu1 %vm1632_vm14, %v4941_v16  ;;  %v5738_v52 = vsel %vm2413_vm9, %v2541_v46, 4293918720  ;;  %vm2632_vm9 = vcmp.eq.s32.totalorder %v5021_v10, %v5484_v23 }
 0x595   :  { %4575 = vmatpush1.msk.msra.mxu1 %vm380_vm10, %v4941_v16  ;;  %v2968_v54 = vadd.s32 1, %v5738_v52  ;;  %vm2984_vm10 = vcmp.eq.s32.totalorder %v5487_v24, %v5067_v19  ;;  %v2966_v19 = vadd.s32 1, %v5748_v57 }
 0x596   :  { %4597 = vmatpush1.msk.msra.mxu0 %vm2984_vm10, %v4941_v16  ;;  %vm2634_vm10 = vcmp.eq.s32.totalorder %v5487_v24, %v5484_v23 }
 0x597   :  { %vm3037_vm4 = vcmp.eq.s32.totalorder %v5206_v13, %v2968_v54  ;;  %3475 = vmatprep.subr.mxu0 %v4939_v3  ;;  %vm3036_vm14 = vcmp.eq.s32.totalorder %v5021_v10, %v2968_v54  ;;  %vm3038_vm3 = vcmp.eq.s32.totalorder %v5487_v24, %v2968_v54  ;;  %vm3031_vm15 = vcmp.eq.s32.totalorder %v5206_v13, %v2966_v19 }
 0x598   :  { %4576 = vmatprep.subr.msk.mxu1 %vm3037_vm4, %v4941_v16  ;;  %4598 = vmatpush2.msk.msra.mxu0 %vm3038_vm3, %v4941_v16  ;;  %vm3030_vm6 = vcmp.eq.s32.totalorder %v5021_v10, %v2966_v19  ;;  %vm3032_vm1 = vcmp.eq.s32.totalorder %v5487_v24, %v2966_v19  ;;  %vm2630_vm4 = vcmp.eq.s32.totalorder %v5206_v13, %v5489_v26 }
 0x599   :  { %4577 = vmatpush2.msk.msra.mxu1 %vm3036_vm14, %v4941_v16  ;;  %3477 = vmatprep.subr.mxu0 %v4939_v3  ;;  %vm2629_vm14 = vcmp.eq.s32.totalorder %v5021_v10, %v5489_v26  ;;  %vm2631_vm3 = vcmp.eq.s32.totalorder %v5487_v24, %v5489_v26 }
 0x59a   :  { %4578 = vmatprep.subr.msk.mxu1 %vm3034_vm8, %v4941_v16  ;;  %4599 = vmatpush2.msk.msra.mxu0 %vm3035_vm7, %v4941_v16  ;;  %vm2627_vm8 = vcmp.eq.s32.totalorder %v5206_v13, %v5498_v36  ;;  %vm2628_vm7 = vcmp.eq.s32.totalorder %v5487_v24, %v5498_v36 }
 0x59b   :  { %4579 = vmatpush2.msk.msra.mxu1 %vm3033_vm5, %v4941_v16  ;;  %3479 = vmatprep.subr.mxu0 %v4939_v3  ;;  %vm2626_vm5 = vcmp.eq.s32.totalorder %v5021_v10, %v5498_v36 }
 0x59c   :  { %4580 = vmatprep.subr.msk.mxu1 %vm3031_vm15, %v4941_v16  ;;  %4600 = vmatpush2.msk.msra.mxu0 %vm3032_vm1, %v4941_v16  ;;  %vm2624_vm15 = vcmp.eq.s32.totalorder %v5206_v13, %v5510_v42  ;;  %vm2625_vm1 = vcmp.eq.s32.totalorder %v5487_v24, %v5510_v42 }
 0x59d   :  { %4581 = vmatpush2.msk.msra.mxu1 %vm3030_vm6, %v4941_v16  ;;  %3558 = vmatprep.subr.mxu0 %v4939_v3  ;;  %vm2623_vm6 = vcmp.eq.s32.totalorder %v5021_v10, %v5510_v42  ;;  %v3636_v42 = vadd.s32 2, %v5524_v51 }
 0x59e   :  { %4601 = vmatprep.subr.msk.mxu1 %vm2633_vm13, %v4941_v16  ;;  %vm2621_vm13 = vcmp.eq.s32.totalorder %v5206_v13, %v5520_v47 }
 0x632   :  { %v5775_v60 = vpop.f32.mrf.mxu1 }
 0x634   :  { %v2947_v9 = vpop.f32.mrf.mxu1 }
 0x636   :  { %v3341_v63 = vpop.f32.mrf.mxu1 }
 0x638   :  { %v3343_v11 = vpop.f32.mrf.mxu1 }
 0x639   :  { %3410 = vmatprep.mubr.f32.mxu1 %v3343_v11  ;;  %3481 = vmatprep.mubr.f32.mxu0 %v3343_v11 }
 0x63a   :  { %3411 = vmatmul.mubr.f32.vlgmr.msra.gmra.mxu1 %v3341_v63  ;;  %3482 = vmatmul.mubr.f32.vlgmr.msra.gmra.mxu0 %v3341_v63 }
 0x63b   :  { %4602 = vmatpush1.msk.msra.mxu1 %vm2632_vm9, %v4941_v16  ;;  %4639 = vmatpush1.msk.msra.mxu0 %vm2634_vm10, %v4941_v16  ;;  %vm2620_vm9 = vcmp.eq.s32.totalorder %v5021_v10, %v5520_v47  ;;  %vm2622_vm10 = vcmp.eq.s32.totalorder %v5487_v24, %v5520_v47 }
 0x63c   :  { %4603 = vmatprep.subr.msk.mxu1 %vm2630_vm4, %v4941_v16  ;;  %3551 = vmatprep.mubr.f32.mxu1 %v2947_v9  ;;  %vm2618_vm4 = vcmp.eq.s32.totalorder %v5206_v13, %v5533_v53 }
 0x63d   :  { %3560 = vmatprep.subr.mxu0 %v4939_v3  ;;  %3622 = vmatprep.mubr.f32.mxu0 %v2947_v9 }
 0x63e   :  { %4604 = vmatpush1.msk.msra.mxu1 %vm2629_vm14, %v4941_v16  ;;  %4640 = vmatpush1.msk.msra.mxu0 %vm2631_vm3, %v4941_v16  ;;  %vm2617_vm14 = vcmp.eq.s32.totalorder %v5021_v10, %v5533_v53  ;;  %vm2619_vm3 = vcmp.eq.s32.totalorder %v5487_v24, %v5533_v53 }
 0x63f   :  { %4605 = vmatprep.subr.msk.mxu1 %vm2627_vm8, %v4941_v16  ;;  %3562 = vmatprep.subr.mxu0 %v4939_v3  ;;  %vm2615_vm8 = vcmp.eq.s32.totalorder %v5206_v13, %v5554_v2 }
 0x640   :  { %4606 = vmatpush1.msk.msra.mxu1 %vm2626_vm5, %v4941_v16  ;;  %4641 = vmatpush1.msk.msra.mxu0 %vm2628_vm7, %v4941_v16  ;;  %vm2614_vm5 = vcmp.eq.s32.totalorder %v5021_v10, %v5554_v2  ;;  %vm2616_vm7 = vcmp.eq.s32.totalorder %v5487_v24, %v5554_v2 }
 0x641   :  { %4607 = vmatprep.subr.msk.mxu1 %vm2624_vm15, %v4941_v16  ;;  %3564 = vmatprep.subr.mxu0 %v4939_v3  ;;  %vm2612_vm15 = vcmp.eq.s32.totalorder %v5206_v13, %v5524_v51 }
 0x642   :  { %4608 = vmatpush1.msk.msra.mxu1 %vm2623_vm6, %v4941_v16  ;;  %4642 = vmatpush1.msk.msra.mxu0 %vm2625_vm1, %v4941_v16  ;;  %vm2611_vm6 = vcmp.eq.s32.totalorder %v5021_v10, %v5524_v51  ;;  %vm2613_vm1 = vcmp.eq.s32.totalorder %v5487_v24, %v5524_v51  ;;  %v3634_v51 = vadd.s32 2, %v5546_v1 }
 0x643   :  { %4609 = vmatprep.subr.msk.mxu1 %vm2621_vm13, %v4941_v16  ;;  %3566 = vmatprep.subr.mxu0 %v4939_v3  ;;  %vm2609_vm13 = vcmp.eq.s32.totalorder %v5206_v13, %v5536_v55 }
 0x644   :  { %4610 = vmatpush1.msk.msra.mxu1 %vm2620_vm9, %v4941_v16  ;;  %4643 = vmatpush1.msk.msra.mxu0 %vm2622_vm10, %v4941_v16  ;;  %vm2608_vm9 = vcmp.eq.s32.totalorder %v5021_v10, %v5536_v55  ;;  %vm2610_vm10 = vcmp.eq.s32.totalorder %v5487_v24, %v5536_v55 }
 0x645   :  { %4611 = vmatprep.subr.msk.mxu1 %vm2618_vm4, %v4941_v16  ;;  %3568 = vmatprep.subr.mxu0 %v4939_v3  ;;  %vm2606_vm4 = vcmp.eq.s32.totalorder %v5206_v13, %v5546_v1 }
 0x646   :  { %4612 = vmatpush1.msk.msra.mxu1 %vm2617_vm14, %v4941_v16  ;;  %4644 = vmatpush1.msk.msra.mxu0 %vm2619_vm3, %v4941_v16  ;;  %vm2605_vm14 = vcmp.eq.s32.totalorder %v5021_v10, %v5546_v1  ;;  %vm2607_vm3 = vcmp.eq.s32.totalorder %v5487_v24, %v5546_v1 }
 0x647   :  { %4613 = vmatprep.subr.msk.mxu1 %vm2615_vm8, %v4941_v16  ;;  %3570 = vmatprep.subr.mxu0 %v4939_v3  ;;  %vm2603_vm8 = vcmp.eq.s32.totalorder %v5206_v13, %v5557_v8 }
 0x648   :  { %4614 = vmatpush1.msk.msra.mxu1 %vm2614_vm5, %v4941_v16  ;;  %4645 = vmatpush1.msk.msra.mxu0 %vm2616_vm7, %v4941_v16  ;;  %vm2602_vm5 = vcmp.eq.s32.totalorder %v5021_v10, %v5557_v8  ;;  %vm2604_vm7 = vcmp.eq.s32.totalorder %v5487_v24, %v5557_v8 }
 0x649   :  { %4615 = vmatprep.subr.msk.mxu1 %vm2612_vm15, %v4941_v16  ;;  %3572 = vmatprep.subr.mxu0 %v4939_v3  ;;  %vm2600_vm15 = vcmp.eq.s32.totalorder %v5206_v13, %v5222_v25 }
 0x64a   :  { %4616 = vmatpush1.msk.msra.mxu1 %vm2611_vm6, %v4941_v16  ;;  %4646 = vmatpush1.msk.msra.mxu0 %vm2613_vm1, %v4941_v16  ;;  %vm2599_vm6 = vcmp.eq.s32.totalorder %v5021_v10, %v5222_v25  ;;  %vm2601_vm1 = vcmp.eq.s32.totalorder %v5487_v24, %v5222_v25 }
 0x64b   :  { %4617 = vmatprep.subr.msk.mxu1 %vm2609_vm13, %v4941_v16  ;;  %3574 = vmatprep.subr.mxu0 %v4939_v3  ;;  %vm2598_vm13 = vcmp.eq.s32.totalorder %v5487_v24, %v5230_v29 }
 0x64c   :  { %4618 = vmatpush1.msk.msra.mxu1 %vm2608_vm9, %v4941_v16  ;;  %4647 = vmatpush1.msk.msra.mxu0 %vm2610_vm10, %v4941_v16  ;;  %vm2595_vm9 = vcmp.eq.s32.totalorder %v5487_v24, %v5236_v34  ;;  %vm6181_vm10 = vcmp.eq.s32.totalorder %v5021_v10, %v5230_v29  ;;  %v3642_v29 = vadd.s32 2, %v5489_v26  ;;  %v3638_v26 = vadd.s32 2, %v5533_v53 }
 0x64d   :  { %4619 = vmatprep.subr.msk.mxu1 %vm2606_vm4, %v4941_v16  ;;  %3576 = vmatprep.subr.mxu0 %v4939_v3  ;;  %vm6182_vm4 = vcmp.eq.s32.totalorder %v5206_v13, %v5236_v34  ;;  %v3633_v53 = vadd.s32 2, %v5557_v8 }
 0x64e   :  { %4620 = vmatpush1.msk.msra.mxu1 %vm2605_vm14, %v4941_v16  ;;  %4648 = vmatpush1.msk.msra.mxu0 %vm2607_vm3, %v4941_v16  ;;  %vm6183_vm14 = vcmp.eq.s32.totalorder %v5021_v10, %v5236_v34  ;;  %vm6184_vm3 = vcmp.eq.s32.totalorder %v5206_v13, %v5030_v14  ;;  %v3641_v34 = vadd.s32 2, %v5498_v36  ;;  %v3637_v36 = vadd.s32 2, %v5554_v2 }
 0x64f   :  { %4621 = vmatprep.subr.msk.mxu1 %vm2603_vm8, %v4941_v16  ;;  %3578 = vmatprep.subr.mxu0 %v4939_v3  ;;  %vm2589_vm8 = vcmp.eq.s32.totalorder %v5487_v24, %v5013_v7 }
 0x650   :  { %4622 = vmatpush1.msk.msra.mxu1 %vm2602_vm5, %v4941_v16  ;;  %4649 = vmatpush1.msk.msra.mxu0 %vm2604_vm7, %v4941_v16  ;;  %vm6185_vm5 = vcmp.eq.s32.totalorder %v5021_v10, %v5030_v14  ;;  %vm2642_vm7 = vcmp.eq.s32.totalorder %v5206_v13, %v5738_v52 }
 0x651   :  { %4623 = vmatprep.subr.msk.mxu1 %vm2600_vm15, %v4941_v16  ;;  %3580 = vmatprep.subr.mxu0 %v4939_v3  ;;  %vm6186_vm15 = vcmp.eq.s32.totalorder %v5206_v13, %v5013_v7 }
 0x652   :  { %4624 = vmatpush1.msk.msra.mxu1 %vm2599_vm6, %v4941_v16  ;;  %4650 = vmatpush1.msk.msra.mxu0 %vm2601_vm1, %v4941_v16  ;;  %vm2641_vm6 = vcmp.eq.s32.totalorder %v5021_v10, %v5738_v52  ;;  %vm2643_vm1 = vcmp.eq.s32.totalorder %v5487_v24, %v5738_v52 }
 0x653   :  { %4625 = vmatprep.subr.msk.mxu1 %vm1451_vm2, %v4941_v16  ;;  %3582 = vmatprep.subr.mxu0 %v4939_v3  ;;  %vm2592_vm2 = vcmp.eq.s32.totalorder %v5487_v24, %v5030_v14  ;;  %v3643_v14 = vadd.s32 2, %v5484_v23  ;;  %v3639_v23 = vadd.s32 2, %v5520_v47  ;;  %v3635_v47 = vadd.s32 2, %v5536_v55 }
 0x654   :  { %4626 = vmatpush1.msk.msra.mxu1 %vm6181_vm10, %v4941_v16  ;;  %4651 = vmatpush1.msk.msra.mxu0 %vm2598_vm13, %v4941_v16  ;;  %vm6187_vm13 = vcmp.eq.s32.totalorder %v5021_v10, %v5013_v7  ;;  %vm2638_vm10 = vcmp.eq.s32.totalorder %v5021_v10, %v5741_v59  ;;  %v4715_v7 = vld [vmem:[%s6159_s5 + $0x8] sm:$0x7]  ;;  %v3632_v55 = vadd.s32 2, %v5222_v25  ;;  %v3646_v25 = vadd.s32 2, %v5738_v52 }
 0x655   :  { %4627 = vmatprep.subr.msk.mxu1 %vm6182_vm4, %v4941_v16  ;;  %3584 = vmatprep.subr.mxu0 %v4939_v3  ;;  %vm2640_vm4 = vcmp.eq.s32.totalorder %v5487_v24, %v5741_v59 }
 0x656   :  { %4628 = vmatpush1.msk.msra.mxu1 %vm6183_vm14, %v4941_v16  ;;  %4652 = vmatpush1.msk.msra.mxu0 %vm2595_vm9, %v4941_v16  ;;  %vm2639_vm9 = vcmp.eq.s32.totalorder %v5206_v13, %v5741_v59  ;;  %vm2635_vm14 = vcmp.eq.s32.totalorder %v5021_v10, %v5748_v57 }
 0x657   :  { %4629 = vmatprep.subr.msk.mxu1 %vm6184_vm3, %v4941_v16  ;;  %3586 = vmatprep.subr.mxu0 %v4939_v3  ;;  %vm2637_vm3 = vcmp.eq.s32.totalorder %v5487_v24, %v5748_v57 }
 0x658   :  { %4630 = vmatpush1.msk.msra.mxu1 %vm6185_vm5, %v4941_v16  ;;  %4653 = vmatpush1.msk.msra.mxu0 %vm2592_vm2, %v4941_v16  ;;  %vm2636_vm2 = vcmp.eq.s32.totalorder %v5206_v13, %v5748_v57  ;;  %vm3705_vm5 = vcmp.eq.s32.totalorder %v5021_v10, %v3643_v14 }
 0x659   :  { %4631 = vmatprep.subr.msk.mxu1 %vm6186_vm15, %v4941_v16  ;;  %3588 = vmatprep.subr.mxu0 %v4939_v3  ;;  %vm3703_vm15 = vcmp.eq.s32.totalorder %v5206_v13, %v3642_v29 }
 0x65a   :  { %4632 = vmatpush1.msk.msra.mxu1 %vm6187_vm13, %v4941_v16  ;;  %4654 = vmatpush1.msk.msra.mxu0 %vm2589_vm8, %v4941_v16  ;;  %vm3706_vm8 = vcmp.eq.s32.totalorder %v5206_v13, %v3643_v14  ;;  %vm3701_vm13 = vcmp.eq.s32.totalorder %v5487_v24, %v3641_v34 }
 0x65b   :  { %4633 = vmatprep.subr.msk.mxu1 %vm2642_vm7, %v4941_v16  ;;  %3616 = vmatprep.subr.mxu0 %v4939_v3  ;;  %vm3707_vm7 = vcmp.eq.s32.totalorder %v5487_v24, %v3643_v14 }
 0x65c   :  { %4634 = vmatpush2.msk.msra.mxu1 %vm2641_vm6, %v4941_v16  ;;  %4655 = vmatpush2.msk.msra.mxu0 %vm2643_vm1, %v4941_v16  ;;  %vm3704_vm6 = vcmp.eq.s32.totalorder %v5487_v24, %v3642_v29  ;;  %vm3700_vm1 = vcmp.eq.s32.totalorder %v5206_v13, %v3641_v34 }
 0x65d   :  { %4635 = vmatprep.subr.msk.mxu1 %vm2639_vm9, %v4941_v16  ;;  %3618 = vmatprep.subr.mxu0 %v4939_v3  ;;  %vm3699_vm9 = vcmp.eq.s32.totalorder %v5021_v10, %v3641_v34 }
 0x65e   :  { %4636 = vmatpush2.msk.msra.mxu1 %vm2638_vm10, %v4941_v16  ;;  %4656 = vmatpush2.msk.msra.mxu0 %vm2640_vm4, %v4941_v16  ;;  %vm3697_vm10 = vcmp.eq.s32.totalorder %v5206_v13, %v3640_v5  ;;  %vm3698_vm4 = vcmp.eq.s32.totalorder %v5487_v24, %v3640_v5 }
 0x65f   :  { %4637 = vmatprep.subr.msk.mxu1 %vm2636_vm2, %v4941_v16  ;;  %3620 = vmatprep.subr.mxu0 %v4939_v3  ;;  %vm3696_vm2 = vcmp.eq.s32.totalorder %v5021_v10, %v3640_v5 }
 0x660   :  { %4638 = vmatpush2.msk.msra.mxu1 %vm2635_vm14, %v4941_v16  ;;  %4657 = vmatpush2.msk.msra.mxu0 %vm2637_vm3, %v4941_v16  ;;  %vm3694_vm14 = vcmp.eq.s32.totalorder %v5206_v13, %v3639_v23  ;;  %vm3695_vm3 = vcmp.eq.s32.totalorder %v5487_v24, %v3639_v23 }
 0x661   :  { %3552 = vmatmul.mubr.f32.vlgmr.msra.gmra.mxu1 %v5775_v60  ;;  %3623 = vmatmul.mubr.f32.vlgmr.msra.gmra.mxu0 %v5775_v60 }
 0x662   :  { %3983 = vmatprep.subr.mxu1 %v5614_v45  ;;  %4017 = vmatprep.mubr.f32.mxu1 %v4939_v3 }
 0x663   :  { %3984 = vmatpush1.msra.mxu1 %v5620_v62  ;;  %4095 = vmatprep.subr.mxu0 %v4939_v3 }
 0x664   :  { %4717 = vmatprep.subr.msk.mxu1 %vm3706_vm8, %v4941_v16  ;;  %4755 = vmatpush1.msk.msra.mxu0 %vm3707_vm7, %v4941_v16  ;;  %vm3693_vm8 = vcmp.eq.s32.totalorder %v5021_v10, %v3639_v23  ;;  %vm3692_vm7 = vcmp.eq.s32.totalorder %v5487_v24, %v3638_v26 }
 0x665   :  { %4716 = vmatmul.mubr.msk.f32.vlgmr.msra.gmra.mxu1 %vm1541_vm11, %v4715_v7  ;;  %vm3702_vm11 = vcmp.eq.s32.totalorder %v5021_v10, %v3642_v29  ;;  %4097 = vmatprep.subr.mxu0 %v4939_v3 }
 0x666   :  { %4718 = vmatpush1.msk.msra.mxu1 %vm3705_vm5, %v4941_v16  ;;  %4756 = vmatpush1.msk.msra.mxu0 %vm3704_vm6, %v4941_v16  ;;  %vm3691_vm5 = vcmp.eq.s32.totalorder %v5206_v13, %v3638_v26  ;;  %vm3689_vm6 = vcmp.eq.s32.totalorder %v5487_v24, %v3637_v36 }
 0x667   :  { %4719 = vmatprep.subr.msk.mxu1 %vm3703_vm15, %v4941_v16  ;;  %4099 = vmatprep.subr.mxu0 %v4939_v3  ;;  %vm3690_vm15 = vcmp.eq.s32.totalorder %v5021_v10, %v3638_v26 }
 0x668   :  { %4720 = vmatpush1.msk.msra.mxu1 %vm3702_vm11, %v4941_v16  ;;  %4757 = vmatpush1.msk.msra.mxu0 %vm3701_vm13, %v4941_v16  ;;  %vm3688_vm11 = vcmp.eq.s32.totalorder %v5206_v13, %v3637_v36  ;;  %vm3685_vm13 = vcmp.eq.s32.totalorder %v5206_v13, %v3636_v42 }
 0x669   :  { %4721 = vmatprep.subr.msk.mxu1 %vm3700_vm1, %v4941_v16  ;;  %4101 = vmatprep.subr.mxu0 %v4939_v3  ;;  %vm3687_vm1 = vcmp.eq.s32.totalorder %v5021_v10, %v3637_v36 }
 0x66a   :  { %4722 = vmatpush1.msk.msra.mxu1 %vm3699_vm9, %v4941_v16  ;;  %4758 = vmatpush1.msk.msra.mxu0 %vm3698_vm4, %v4941_v16  ;;  %vm3686_vm9 = vcmp.eq.s32.totalorder %v5487_v24, %v3636_v42  ;;  %vm3682_vm4 = vcmp.eq.s32.totalorder %v5206_v13, %v3635_v47 }
 0x66b   :  { %4723 = vmatprep.subr.msk.mxu1 %vm3697_vm10, %v4941_v16  ;;  %4103 = vmatprep.subr.mxu0 %v4939_v3  ;;  %vm3684_vm10 = vcmp.eq.s32.totalorder %v5021_v10, %v3636_v42 }
 0x66c   :  { %4724 = vmatpush1.msk.msra.mxu1 %vm3696_vm2, %v4941_v16  ;;  %4759 = vmatpush1.msk.msra.mxu0 %vm3695_vm3, %v4941_v16  ;;  %vm3683_vm2 = vcmp.eq.s32.totalorder %v5487_v24, %v3635_v47  ;;  %vm3679_vm3 = vcmp.eq.s32.totalorder %v5206_v13, %v3634_v51 }
 0x66d   :  { %4725 = vmatprep.subr.msk.mxu1 %vm3694_vm14, %v4941_v16  ;;  %4105 = vmatprep.subr.mxu0 %v4939_v3  ;;  %vm3681_vm14 = vcmp.eq.s32.totalorder %v5021_v10, %v3635_v47 }
 0x66e   :  { %4726 = vmatpush1.msk.msra.mxu1 %vm3693_vm8, %v4941_v16  ;;  %4760 = vmatpush1.msk.msra.mxu0 %vm3692_vm7, %v4941_v16  ;;  %vm3680_vm8 = vcmp.eq.s32.totalorder %v5487_v24, %v3634_v51  ;;  %vm3676_vm7 = vcmp.eq.s32.totalorder %v5206_v13, %v3633_v53 }
 0x66f   :  { %4727 = vmatprep.subr.msk.mxu1 %vm3691_vm5, %v4941_v16  ;;  %4107 = vmatprep.subr.mxu0 %v4939_v3  ;;  %vm3678_vm5 = vcmp.eq.s32.totalorder %v5021_v10, %v3634_v51 }
 0x670   :  { %4728 = vmatpush1.msk.msra.mxu1 %vm3690_vm15, %v4941_v16  ;;  %4761 = vmatpush1.msk.msra.mxu0 %vm3689_vm6, %v4941_v16  ;;  %vm3677_vm15 = vcmp.eq.s32.totalorder %v5487_v24, %v3633_v53  ;;  %vm3673_vm6 = vcmp.eq.s32.totalorder %v5206_v13, %v3632_v55 }
 0x671   :  { %4729 = vmatprep.subr.msk.mxu1 %vm3688_vm11, %v4941_v16  ;;  %4109 = vmatprep.subr.mxu0 %v4939_v3  ;;  %vm3675_vm11 = vcmp.eq.s32.totalorder %v5021_v10, %v3633_v53 }
 0x672   :  { %4730 = vmatpush1.msk.msra.mxu1 %vm3687_vm1, %v4941_v16  ;;  %4762 = vmatpush1.msk.msra.mxu0 %vm3686_vm9, %v4941_v16  ;;  %vm3674_vm1 = vcmp.eq.s32.totalorder %v5487_v24, %v3632_v55  ;;  %vm3671_vm9 = vcmp.eq.s32.totalorder %v5487_v24, %v5424_v58  ;;  %v4168_v58 = vld [vmem:[%s6160_s6] sm:$0x7]  ;;  %s4943_s6 = smov [#allocation2]  }
 0x673   :  { %4731 = vmatprep.subr.msk.mxu1 %vm3685_vm13, %v4941_v16  ;;  %4111 = vmatprep.subr.mxu0 %v4939_v3  ;;  %vm3672_vm13 = vcmp.eq.s32.totalorder %v5021_v10, %v3632_v55  ;;  %s4189_s25 = sshll.u32 %s4943_s6, 4  ;;  %s4190_s25 = int_to_ptr.vmem [resolvable:$true] %s4189_s25 }
 0x674   :  { %4732 = vmatpush1.msk.msra.mxu1 %vm3684_vm10, %v4941_v16  ;;  %4763 = vmatpush1.msk.msra.mxu0 %vm3683_vm2, %v4941_v16  ;;  %vm3668_vm10 = vcmp.eq.s32.totalorder %v5487_v24, %v5431_v61  ;;  %vm6188_vm2 = vcmp.eq.s32.totalorder %v5206_v13, %v5431_v61  ;;  %s4917_s26 = scalar_lea.vmem %s4190_s25, 192  ;;  %p4922_p1 = scmp.lt.s32.totalorder %s4190_s25, %s4190_s25 }
 0x675   :  { %4733 = vmatprep.subr.msk.mxu1 %vm3682_vm4, %v4941_v16  ;;  %4113 = vmatprep.subr.mxu0 %v4939_v3  ;;  %vm3665_vm4 = vcmp.eq.s32.totalorder %v5487_v24, %v5111_v28  ;;  %p4918_p0 = scmp.ne.s32.totalorder %s4190_s25, %s4917_s26  ;;  %p4923_p2 = scmp.lt.s32.totalorder %s4917_s26, %s4917_s26 }
 0x676   :  { %4734 = vmatpush1.msk.msra.mxu1 %vm3681_vm14, %v4941_v16  ;;  %4764 = vmatpush1.msk.msra.mxu0 %vm3680_vm8, %v4941_v16  ;;  %vm6191_vm14 = vcmp.eq.s32.totalorder %v5021_v10, %v5111_v28  ;;  %vm6193_vm8 = vcmp.eq.s32.totalorder %v5021_v10, %v5120_v30 }
 0x677   :  { %4735 = vmatprep.subr.msk.mxu1 %vm3679_vm3, %v4941_v16  ;;  %4115 = vmatprep.subr.mxu0 %v4939_v3  ;;  %vm6192_vm3 = vcmp.eq.s32.totalorder %v5206_v13, %v5120_v30  ;;  %p4924_p3 = por %p4923_p2, %p4922_p1 }
 0x678   :  { %4736 = vmatpush1.msk.msra.mxu1 %vm3678_vm5, %v4941_v16  ;;  %4765 = vmatpush1.msk.msra.mxu0 %vm3677_vm15, %v4941_v16  ;;  %vm3662_vm5 = vcmp.eq.s32.totalorder %v5487_v24, %v5120_v30  ;;  %vm3714_vm15 = vcmp.eq.s32.totalorder %v5021_v10, %v3646_v25  ;;  %v3644_v30 = vadd.s32 2, %v5748_v57 }
 0x679   :  { %4737 = vmatprep.subr.msk.mxu1 %vm3676_vm7, %v4941_v16  ;;  %4117 = vmatprep.subr.mxu0 %v4939_v3  ;;  %vm3715_vm7 = vcmp.eq.s32.totalorder %v5206_v13, %v3646_v25  ;;  %p4925_p4 = pnand %p4924_p3, %p4918_p0 }
 0x67a   :  { %4738 = vmatpush1.msk.msra.mxu1 %vm3675_vm11, %v4941_v16  ;;  %4766 = vmatpush1.msk.msra.mxu0 %vm3674_vm1, %v4941_v16  ;;  %vm3716_vm11 = vcmp.eq.s32.totalorder %v5487_v24, %v3646_v25 }
 0x67b   :  { %4739 = vmatprep.subr.msk.mxu1 %vm3673_vm6, %v4941_v16  ;;  %4119 = vmatprep.subr.mxu0 %v4939_v3 }
 0x67c   :  { %4740 = vmatpush1.msk.msra.mxu1 %vm3672_vm13, %v4941_v16  ;;  %4767 = vmatpush1.msk.msra.mxu0 %vm3671_vm9, %v4941_v16  ;;  %vm3709_vm9 = vcmp.eq.s32.totalorder %v5206_v13, %v3644_v30 }
 0x67d   :  { %4741 = vmatprep.subr.msk.mxu1 %vm1967_vm12, %v4941_v16  ;;  %4121 = vmatprep.subr.mxu0 %v4939_v3  ;;  %vm6189_vm12 = vcmp.eq.s32.totalorder %v5021_v10, %v5431_v61 }
 0x67e   :  { %4742 = vmatpush1.msk.msra.mxu1 %vm1966_vm0, %v4941_v16  ;;  %4768 = vmatpush1.msk.msra.mxu0 %vm3668_vm10, %v4941_v16  ;;  %vm6190_vm0 = vcmp.eq.s32.totalorder %v5206_v13, %v5111_v28  ;;  %v3645_v28 = vadd.s32 2, %v5741_v59  ;;  %vm3708_vm10 = vcmp.eq.s32.totalorder %v5021_v10, %v3644_v30 }
 0x67f   :  { %4743 = vmatprep.subr.msk.mxu1 %vm6188_vm2, %v4941_v16  ;;  %4123 = vmatprep.subr.mxu0 %v4939_v3 }
 0x680   :  { %4744 = vmatpush1.msk.msra.mxu1 %vm6189_vm12, %v4941_v16  ;;  %4769 = vmatpush1.msk.msra.mxu0 %vm3665_vm4, %v4941_v16  ;;  %vm3712_vm6 = vcmp.eq.s32.totalorder %v5206_v13, %v3645_v28  ;;  %vm3711_vm1 = vcmp.eq.s32.totalorder %v5021_v10, %v3645_v28  ;;  %vm3713_vm13 = vcmp.eq.s32.totalorder %v5487_v24, %v3645_v28 }
 0x681   :  { %4745 = vmatprep.subr.msk.mxu1 %vm6190_vm0, %v4941_v16  ;;  %4125 = vmatprep.subr.mxu0 %v4939_v3  ;;  %vm3710_vm4 = vcmp.eq.s32.totalorder %v5487_v24, %v3644_v30 }
 0x682   :  { %4746 = vmatpush1.msk.msra.mxu1 %vm6191_vm14, %v4941_v16  ;;  %4770 = vmatpush1.msk.msra.mxu0 %vm3662_vm5, %v4941_v16 }
 0x683   :  { %4747 = vmatprep.subr.msk.mxu1 %vm6192_vm3, %v4941_v16  ;;  %4153 = vmatprep.subr.mxu0 %v4939_v3 }
 0x684   :  { %4748 = vmatpush1.msk.msra.mxu1 %vm6193_vm8, %v4941_v16  ;;  %4771 = vmatpush2.msk.msra.mxu0 %vm3716_vm11, %v4941_v16 }
 0x685   :  { %4749 = vmatprep.subr.msk.mxu1 %vm3715_vm7, %v4941_v16  ;;  %4155 = vmatprep.subr.mxu0 %v4939_v3 }
 0x686   :  { %4750 = vmatpush2.msk.msra.mxu1 %vm3714_vm15, %v4941_v16  ;;  %4772 = vmatpush2.msk.msra.mxu0 %vm3713_vm13, %v4941_v16 }
 0x687   :  { %4751 = vmatprep.subr.msk.mxu1 %vm3712_vm6, %v4941_v16  ;;  %4157 = vmatprep.subr.mxu0 %v4939_v3 }
 0x688   :  { %4752 = vmatpush2.msk.msra.mxu1 %vm3711_vm1, %v4941_v16  ;;  %4773 = vmatpush2.msk.msra.mxu0 %vm3710_vm4, %v4941_v16 }
 0x689   :  { %4753 = vmatprep.subr.msk.mxu1 %vm3709_vm9, %v4941_v16  ;;  %4171 = vperm.xlu1 %4916, %v4168_v58  }
 0x68a   :  { %4754 = vmatpush2.msk.msra.mxu1 %vm3708_vm10, %v4941_v16 }
 0x6fa   :  { %v3483_v61 = vpop.f32.mrf.mxu0  ;;  %v3412_v13 = vpop.f32.mrf.mxu1 }
 0x6fc   :  { %v3485_v1 = vpop.f32.mrf.mxu0  ;;  %v3414_v2 = vpop.f32.mrf.mxu1 }
 0x704   :  { %v4172_v16 = vpop.permute.xlu1 %4171 }
 0x721   :  { %v3553_v10 = vpop.f32.mrf.mxu1  ;;  %v3624_v8 = vpop.f32.mrf.mxu0 }
 0x722   :  { %v3554_v12 = vadd.f32 %v3553_v10, %v3412_v13  ;;  %v3625_v15 = vadd.f32 %v3624_v8, %v3483_v61 }
 0x723   :  { %v3555_v3 = vpop.f32.mrf.mxu1  ;;  %v3626_v17 = vpop.f32.mrf.mxu0 }
 0x724   :  { %v3556_v24 = vadd.f32 %v3555_v3, %v3414_v2 }
 0x725   :  { %v4019_v20 = vpop.f32.mrf.mxu1 }
 0x727   :  { %v4021_v21 = vpop.f32.mrf.mxu1 }
 0x728   :  { %4088 = vmatprep.mubr.f32.mxu1 %v4021_v21  ;;  %4159 = vmatprep.mubr.f32.mxu0 %v4021_v21 }
 0x729   :  { %4089 = vmatmul.mubr.f32.vlgmr.msra.gmra.mxu1 %v4019_v20  ;;  %4160 = vmatmul.mubr.f32.vlgmr.msra.gmra.mxu0 %v4019_v20 }
 0x7e9   :  { %v4090_v22 = vpop.f32.mrf.mxu1  ;;  %v4161_v27 = vpop.f32.mrf.mxu0 }
 0x7ea   :  { %v4165_v31 = vadd.f32 %v4090_v22, %v3554_v12  ;;  %v4167_v32 = vadd.f32 %v4161_v27, %v3625_v15 }
 0x7eb   :  { %v4092_v37 = vpop.f32.mrf.mxu1  ;;  %v4163_v39 = vpop.f32.mrf.mxu0 }
 0x7ec   :  { %v4176_v40 = vadd.f32 %v4172_v16, %v4167_v32  ;;  %v4166_v43 = vadd.f32 %v4092_v37, %v3556_v24  ;;  %v4174_v44 = vadd.f32 %v4172_v16, %v4165_v31 }
 0x7ee   :  { %4182 = vst [vmem:[#allocation2 + $0x8] sm:$0x7] %v4176_v40  ;;  %v4175_v45 = vadd.f32 %v4172_v16, %v4166_v43 }
 0x7f0   :  { %v4179_v48 = vcombine.low %v4174_v44, %v4175_v45 }
 0x7f2   :  { %4181 = vst [vmem:[#allocation2] sm:$0x77] %v4179_v48 }
 0x7f3   :  { %4928 = shalt.err (!%p4925_p4)
}
 0x7f4   :  { %4192 = dma.vmem_to_hbm [thread:$0]  %s4190_s25, 192, %s6161_s7, [#allocation3]  }
 0x7f5   :  { %4937 = dma.done.wait [#allocation3], 192  }
 0x7f6   :  { %4938 = vsyncadd [#allocation3], 4294967104 }
 0x7f7   :  { %4196 = vsyncpa [#allocation3], 1 }

</bundles_post_ra>
